<compile_context>
chip_gen: v7x
topology: tpu7x:2x2x1
jax: 0.10.0
libtpu: 0.0.40
codegen_flags: <defaults>
</compile_context>

<pallas_src>
import functools
import math

import jax
import jax.numpy as jnp
from jax.experimental import pallas as pl
from jax.experimental.pallas import tpu as pltpu


# --------------------------- in-kernel helpers ------------------------------

def _layernorm_f32(x, g, b, eps=1e-5):
    mu = jnp.mean(x, axis=-1, keepdims=True)
    var = jnp.mean(jnp.square(x - mu), axis=-1, keepdims=True)
    return (x - mu) * jax.lax.rsqrt(var + eps) * g + b


# ------------------------ fused image + text kernel -------------------------

def _fused_kernel(im2col_ref, x_ref,
                  convw_ref, convb_ref, fcw_ref, fcb_ref, clswi_ref,
                  ln1g_ref, ln1b_ref, wqkv_ref, bqkv_ref, wo_ref, bo_ref,
                  ln2g_ref, ln2b_ref, wfc_ref, bfc_ref, wmp_ref, bmp_ref,
                  lnfg_ref, lnfb_ref, wclst_ref, bcls_ref,
                  o_ref, *, heads):
    # ------------------------------ image path ------------------------------
    # conv3x3 (stride 1, pad 1) as ONE im2col matmul (K = 9*Cin), f32 acc.
    conv = jnp.dot(im2col_ref[0], convw_ref[...],
                   preferred_element_type=jnp.float32)            # (HW, Cmid)
    conv = jnp.maximum(conv + convb_ref[...], 0.0)                # bias + ReLU
    pooled = jnp.mean(conv, axis=0, keepdims=True)                # GAP (1,Cmid)
    feat = jnp.dot(pooled.astype(jnp.bfloat16), fcw_ref[...],
                   preferred_element_type=jnp.float32) + fcb_ref[...]  # (1, Fp)
    # image half of the classifier (the bias is added once, in the epilogue)
    img_logits = jnp.dot(feat.astype(jnp.bfloat16), clswi_ref[...],
                         preferred_element_type=jnp.float32)      # (1, Vp)

    # ------------------------------ text path -------------------------------
    x = x_ref[0].astype(jnp.float32)                              # (T, H)
    T, H = x.shape
    Dh = H // heads
    scale = 1.0 / math.sqrt(Dh)

    row = jax.lax.broadcasted_iota(jnp.int32, (T, T), 0)
    col = jax.lax.broadcasted_iota(jnp.int32, (T, T), 1)
    causal = col <= row

    # ---- attention (pre-LN): fused QKV matmul + fused output projection ----
    h = _layernorm_f32(x, ln1g_ref[...], ln1b_ref[...])
    qkv = jnp.dot(h.astype(jnp.bfloat16), wqkv_ref[...],
                  preferred_element_type=jnp.float32) + bqkv_ref[...]  # (T,3H)

    heads_out = []
    # At T=8 the full (T,T) f32 scores fit comfortably in vregs; a KV-blocked
    # online-softmax loop only becomes worthwhile for T >~ 128.
    for hh in range(heads):                                       # static unroll
        q = qkv[:, hh * Dh:(hh + 1) * Dh]
        k = qkv[:, H + hh * Dh:H + (hh + 1) * Dh]
        v = qkv[:, 2 * H + hh * Dh:2 * H + (hh + 1) * Dh]
        # contract last dims of q and k -> no explicit transpose of K
        s = jax.lax.dot_general(
            (q * scale).astype(jnp.bfloat16), k.astype(jnp.bfloat16),
            (((1,), (1,)), ((), ())), preferred_element_type=jnp.float32)
        s = jnp.where(causal, s, jnp.float32(-1e30))              # causal mask
        s = s - jnp.max(s, axis=-1, keepdims=True)
        p = jnp.exp(s)
        p = p / jnp.sum(p, axis=-1, keepdims=True)                # exact softmax
        heads_out.append(jnp.dot(p.astype(jnp.bfloat16), v.astype(jnp.bfloat16),
                                 preferred_element_type=jnp.float32))  # (T, Dh)
    attn = jnp.concatenate(heads_out, axis=-1)                    # (T, H)
    attn = jnp.dot(attn.astype(jnp.bfloat16), wo_ref[...],
                   preferred_element_type=jnp.float32) + bo_ref[...]
    x = x + attn                                                  # residual

    # ---- MLP (pre-LN) ----
    h = _layernorm_f32(x, ln2g_ref[...], ln2b_ref[...])
    h = jnp.dot(h.astype(jnp.bfloat16), wfc_ref[...],
                preferred_element_type=jnp.float32) + bfc_ref[...]
    h = jax.nn.gelu(h, approximate=True)                          # GPT-2 gelu_new
    h = jnp.dot(h.astype(jnp.bfloat16), wmp_ref[...],
                preferred_element_type=jnp.float32) + bmp_ref[...]
    x = x + h                                                     # residual

    # ---- final LN + text half of classifier + broadcast image half + bias --
    hid = _layernorm_f32(x, lnfg_ref[...], lnfb_ref[...])
    logits = jnp.dot(hid.astype(jnp.bfloat16), wclst_ref[...],
                     preferred_element_type=jnp.float32)
    logits = logits + img_logits + bcls_ref[...]                  # (T, Vp)
    o_ref[...] = logits[None].astype(o_ref.dtype)


# ------------------------------- parameters ---------------------------------

def init_params(key, *, cin, cmid, img_feat, vocab, hidden, mlp, max_pos):
    ks = jax.random.split(key, 10)

    def nrm(k, shape, scale=0.02, dtype=jnp.bfloat16):
        return (scale * jax.random.normal(k, shape)).astype(dtype)

    return {
        # "resnet" surrogate: conv3x3 + ReLU + GAP + fc -> img_feat (1000-d)
        "conv_w": nrm(ks[0], (3, 3, cin, cmid), 0.1),
        "conv_b": jnp.zeros((cmid,), jnp.float32),
        "res_fc_w": nrm(ks[1], (cmid, img_feat)),
        "res_fc_b": jnp.zeros((img_feat,), jnp.float32),
        # "gpt2" surrogate: wte + wpe + 1 pre-LN transformer block + ln_f
        "wte": nrm(ks[2], (vocab, hidden), 0.02, jnp.float32),
        "wpe": nrm(ks[3], (max_pos, hidden), 0.01, jnp.float32),
        "ln1_g": jnp.ones((hidden,), jnp.float32),
        "ln1_b": jnp.zeros((hidden,), jnp.float32),
        "attn_qkv_w": nrm(ks[4], (hidden, 3 * hidden)),
        "attn_qkv_b": jnp.zeros((3 * hidden,), jnp.float32),
        "attn_proj_w": nrm(ks[5], (hidden, hidden)),
        "attn_proj_b": jnp.zeros((hidden,), jnp.float32),
        "ln2_g": jnp.ones((hidden,), jnp.float32),
        "ln2_b": jnp.zeros((hidden,), jnp.float32),
        "mlp_fc_w": nrm(ks[6], (hidden, mlp)),
        "mlp_fc_b": jnp.zeros((mlp,), jnp.float32),
        "mlp_proj_w": nrm(ks[7], (mlp, hidden)),
        "mlp_proj_b": jnp.zeros((hidden,), jnp.float32),
        "lnf_g": jnp.ones((hidden,), jnp.float32),
        "lnf_b": jnp.zeros((hidden,), jnp.float32),
        # classifier: Linear(1000 + hidden, vocab)
        "cls_w": nrm(ks[8], (img_feat + hidden, vocab)),
        "cls_b": jnp.zeros((vocab,), jnp.float32),
    }


# ------------------------------- forward ------------------------------------

def resnet_gpt2_forward(params, images, question, *, heads):
    img_feat = params["res_fc_w"].shape[1]
    H = params["wte"].shape[1]
    V = params["cls_w"].shape[1]
    MLP = params["mlp_fc_w"].shape[1]

    # ---- lane padding (zero rows/cols -> math unchanged, stores lane-dense)
    fpad = (-img_feat) % 128
    vpad = (-V) % 128
    Fp, Vp = img_feat + fpad, V + vpad

    res_fc_w = jnp.pad(params["res_fc_w"], ((0, 0), (0, fpad)))
    res_fc_b = jnp.pad(params["res_fc_b"], ((0, fpad),))
    # classifier split: cat([img, hid]) @ W + b == img @ W[:F] + hid @ W[F:] + b
    cls_w_img = jnp.pad(params["cls_w"][:img_feat], ((0, fpad), (0, vpad)))
    cls_w_txt = jnp.pad(params["cls_w"][img_feat:], ((0, 0), (0, vpad)))
    cls_b = jnp.pad(params["cls_b"], ((0, vpad),))

    # ---- im2col of the 3x3/s1/p1 conv, built once in the wrapper (XLA glue)
    x = jnp.transpose(images, (0, 2, 3, 1))                       # NCHW -> NHWC
    B, Hi, Wi, Cin = x.shape
    xpad = jnp.pad(x, ((0, 0), (1, 1), (1, 1), (0, 0)))
    taps = [xpad[:, dy:dy + Hi, dx:dx + Wi, :]
            for dy in range(3) for dx in range(3)]
    im2col = jnp.concatenate(taps, axis=-1).reshape(B, Hi * Wi, 9 * Cin)
    im2col = im2col.astype(jnp.bfloat16)
    conv_w = params["conv_w"].reshape(9 * Cin, -1).astype(jnp.bfloat16)
    Cmid = conv_w.shape[1]

    # ---- token + position embedding (gather stays as XLA glue) ----
    _, T = question.shape
    x_emb = jnp.take(params["wte"], question, axis=0) + params["wpe"][:T][None]

    def row(a):
        return a.reshape(1, -1)

    def full(shape):
        n = len(shape)
        return pl.BlockSpec(shape, lambda b, _n=n: (0,) * _n)

    # NOTE: the grid-invariant weight blocks below could additionally be
    # single-buffered (pipeline_mode=pl.Buffered(1)) to halve weight VMEM on
    # v7x at real GPT-2 sizes; with the tiny surrogate weights the default
    # double-buffering is well within budget.
    kernel = functools.partial(_fused_kernel, heads=heads)
    out = pl.pallas_call(
        kernel,
        grid=(B,),
        in_specs=[
            pl.BlockSpec((1, Hi * Wi, 9 * Cin), lambda b: (b, 0, 0)),
            pl.BlockSpec((1, T, H), lambda b: (b, 0, 0)),
            full((9 * Cin, Cmid)),
            full((1, Cmid)),
            full((Cmid, Fp)),
            full((1, Fp)),
            full((Fp, Vp)),
            full((1, H)), full((1, H)),
            full((H, 3 * H)), full((1, 3 * H)),
            full((H, H)), full((1, H)),
            full((1, H)), full((1, H)),
            full((H, MLP)), full((1, MLP)),
            full((MLP, H)), full((1, H)),
            full((1, H)), full((1, H)),
            full((H, Vp)), full((1, Vp)),
        ],
        out_specs=pl.BlockSpec((1, T, Vp), lambda b: (b, 0, 0)),
        out_shape=jax.ShapeDtypeStruct((B, T, Vp), jnp.float32),
        compiler_params=pltpu.CompilerParams(
            dimension_semantics=("parallel",),
            vmem_limit_bytes=32 * 1024 * 1024),
    )(im2col, x_emb,
      conv_w, row(params["conv_b"]),
      res_fc_w, row(res_fc_b),
      cls_w_img,
      row(params["ln1_g"]), row(params["ln1_b"]),
      params["attn_qkv_w"], row(params["attn_qkv_b"]),
      params["attn_proj_w"], row(params["attn_proj_b"]),
      row(params["ln2_g"]), row(params["ln2_b"]),
      params["mlp_fc_w"], row(params["mlp_fc_b"]),
      params["mlp_proj_w"], row(params["mlp_proj_b"]),
      row(params["lnf_g"]), row(params["lnf_b"]),
      cls_w_txt, row(cls_b))

    return out[:, :, :V]                                           # drop vocab pad


if __name__ == "__main__":
    B, CIN, HW_IMG = 2, 4, 16        # images: [2, 4, 16, 16] NCHW
    T, VOCAB = 8, 64                 # question: [2, 8] token ids
    HIDDEN, HEADS, MLP = 32, 2, 128  # surrogate GPT-2 hidden size
    CMID, IMG_FEAT = 32, 1000        # resnet head output is 1000-d

    key = jax.random.PRNGKey(0)
    kp, ki, kq = jax.random.split(key, 3)
    params = init_params(kp, cin=CIN, cmid=CMID, img_feat=IMG_FEAT,
                         vocab=VOCAB, hidden=HIDDEN, mlp=MLP, max_pos=64)
    images = jax.random.normal(ki, (B, CIN, HW_IMG, HW_IMG), dtype=jnp.float32)
    question = jax.random.randint(kq, (B, T), 0, VOCAB, dtype=jnp.int32)

    fwd = jax.jit(functools.partial(resnet_gpt2_forward, heads=HEADS))
    out = fwd(params, images, question)
    jax.block_until_ready(out)
    assert out.shape == (B, T, VOCAB) and out.dtype == jnp.float32
    assert bool(jnp.all(jnp.isfinite(out)))
    print("KERNEL_OK")
</pallas_src>

<mosaic_0001>
module attributes {stable_mosaic.version = 11 : i64} {
  func.func @_fused_kernel(%arg0: i32, %arg1: memref<1x256x36xbf16, #tpu.memory_space<vmem>>, %arg2: memref<1x8x32xf32, #tpu.memory_space<vmem>>, %arg3: memref<36x32xbf16, #tpu.memory_space<vmem>>, %arg4: memref<1x32xf32, #tpu.memory_space<vmem>>, %arg5: memref<32x1024xbf16, #tpu.memory_space<vmem>>, %arg6: memref<1x1024xf32, #tpu.memory_space<vmem>>, %arg7: memref<1024x128xbf16, #tpu.memory_space<vmem>>, %arg8: memref<1x32xf32, #tpu.memory_space<vmem>>, %arg9: memref<1x32xf32, #tpu.memory_space<vmem>>, %arg10: memref<32x96xbf16, #tpu.memory_space<vmem>>, %arg11: memref<1x96xf32, #tpu.memory_space<vmem>>, %arg12: memref<32x32xbf16, #tpu.memory_space<vmem>>, %arg13: memref<1x32xf32, #tpu.memory_space<vmem>>, %arg14: memref<1x32xf32, #tpu.memory_space<vmem>>, %arg15: memref<1x32xf32, #tpu.memory_space<vmem>>, %arg16: memref<32x128xbf16, #tpu.memory_space<vmem>>, %arg17: memref<1x128xf32, #tpu.memory_space<vmem>>, %arg18: memref<128x32xbf16, #tpu.memory_space<vmem>>, %arg19: memref<1x32xf32, #tpu.memory_space<vmem>>, %arg20: memref<1x32xf32, #tpu.memory_space<vmem>>, %arg21: memref<1x32xf32, #tpu.memory_space<vmem>>, %arg22: memref<32x128xbf16, #tpu.memory_space<vmem>>, %arg23: memref<1x128xf32, #tpu.memory_space<vmem>>, %arg24: memref<1x8x128xf32, #tpu.memory_space<vmem>>) attributes {dimension_semantics = [#tpu.dimension_semantics<parallel>], iteration_bounds = array<i64: 2>, scalar_prefetch = 0 : i64, scratch_operands = 0 : i64, tpu.core_type = #tpu.core_type<tc>, window_params = [{transform_indices = @transform_0, window_bounds = array<i64: 1, 256, 36>}, {transform_indices = @transform_1, window_bounds = array<i64: 1, 8, 32>}, {pipeline_mode = #tpu.pipeline_mode<synchronous>, transform_indices = @transform_2, window_bounds = array<i64: 36, 32>}, {pipeline_mode = #tpu.pipeline_mode<synchronous>, transform_indices = @transform_3, window_bounds = array<i64: 1, 32>}, {pipeline_mode = #tpu.pipeline_mode<synchronous>, transform_indices = @transform_4, window_bounds = array<i64: 32, 1024>}, {pipeline_mode = #tpu.pipeline_mode<synchronous>, transform_indices = @transform_5, window_bounds = array<i64: 1, 1024>}, {pipeline_mode = #tpu.pipeline_mode<synchronous>, transform_indices = @transform_6, window_bounds = array<i64: 1024, 128>}, {pipeline_mode = #tpu.pipeline_mode<synchronous>, transform_indices = @transform_7, window_bounds = array<i64: 1, 32>}, {pipeline_mode = #tpu.pipeline_mode<synchronous>, transform_indices = @transform_8, window_bounds = array<i64: 1, 32>}, {pipeline_mode = #tpu.pipeline_mode<synchronous>, transform_indices = @transform_9, window_bounds = array<i64: 32, 96>}, {pipeline_mode = #tpu.pipeline_mode<synchronous>, transform_indices = @transform_10, window_bounds = array<i64: 1, 96>}, {pipeline_mode = #tpu.pipeline_mode<synchronous>, transform_indices = @transform_11, window_bounds = array<i64: 32, 32>}, {pipeline_mode = #tpu.pipeline_mode<synchronous>, transform_indices = @transform_12, window_bounds = array<i64: 1, 32>}, {pipeline_mode = #tpu.pipeline_mode<synchronous>, transform_indices = @transform_13, window_bounds = array<i64: 1, 32>}, {pipeline_mode = #tpu.pipeline_mode<synchronous>, transform_indices = @transform_14, window_bounds = array<i64: 1, 32>}, {pipeline_mode = #tpu.pipeline_mode<synchronous>, transform_indices = @transform_15, window_bounds = array<i64: 32, 128>}, {pipeline_mode = #tpu.pipeline_mode<synchronous>, transform_indices = @transform_16, window_bounds = array<i64: 1, 128>}, {pipeline_mode = #tpu.pipeline_mode<synchronous>, transform_indices = @transform_17, window_bounds = array<i64: 128, 32>}, {pipeline_mode = #tpu.pipeline_mode<synchronous>, transform_indices = @transform_18, window_bounds = array<i64: 1, 32>}, {pipeline_mode = #tpu.pipeline_mode<synchronous>, transform_indices = @transform_19, window_bounds = array<i64: 1, 32>}, {pipeline_mode = #tpu.pipeline_mode<synchronous>, transform_indices = @transform_20, window_bounds = array<i64: 1, 32>}, {pipeline_mode = #tpu.pipeline_mode<synchronous>, transform_indices = @transform_21, window_bounds = array<i64: 32, 128>}, {pipeline_mode = #tpu.pipeline_mode<synchronous>, transform_indices = @transform_22, window_bounds = array<i64: 1, 128>}, {transform_indices = @transform_23, window_bounds = array<i64: 1, 8, 128>}]} {
    %c0 = arith.constant 0 : index
    %c0_0 = arith.constant 0 : index
    %c0_1 = arith.constant 0 : index
    %0 = vector.load %arg1[%c0, %c0_0, %c0_1] : memref<1x256x36xbf16, #tpu.memory_space<vmem>>, vector<1x256x36xbf16>
    %1 = vector.shape_cast %0 : vector<1x256x36xbf16> to vector<256x36xbf16>
    %c0_2 = arith.constant 0 : index
    %c0_3 = arith.constant 0 : index
    %2 = vector.load %arg3[%c0_2, %c0_3] : memref<36x32xbf16, #tpu.memory_space<vmem>>, vector<36x32xbf16>
    %cst = arith.constant dense<0.000000e+00> : vector<256x32xf32>
    %3 = tpu.matmul %1, %2, %cst {dimension_numbers = #tpu.dot_dimension_numbers<[1], [0], [0], [1], [0, 0, 1, 1], [], []>} : vector<256x36xbf16>, vector<36x32xbf16>, vector<256x32xf32> -> vector<256x32xf32>
    %c0_4 = arith.constant 0 : index
    %c0_5 = arith.constant 0 : index
    %4 = vector.load %arg4[%c0_4, %c0_5] : memref<1x32xf32, #tpu.memory_space<vmem>>, vector<1x32xf32>
    %5 = vector.broadcast %4 : vector<1x32xf32> to vector<256x32xf32>
    %6 = arith.addf %3, %5 : vector<256x32xf32>
    %cst_6 = arith.constant 0.000000e+00 : f32
    %7 = vector.broadcast %cst_6 : f32 to vector<256x32xf32>
    %8 = arith.maximumf %6, %7 : vector<256x32xf32>
    %cst_7 = arith.constant dense<0.000000e+00> : vector<32xf32>
    %9 = vector.multi_reduction <add>, %8, %cst_7 [0] : vector<256x32xf32> to vector<32xf32>
    %10 = vector.shape_cast %9 : vector<32xf32> to vector<1x32xf32>
    %cst_8 = arith.constant 2.560000e+02 : f32
    %11 = vector.broadcast %cst_8 : f32 to vector<1x32xf32>
    %12 = arith.divf %10, %11 : vector<1x32xf32>
    %13 = arith.truncf %12 : vector<1x32xf32> to vector<1x32xbf16>
    %c0_9 = arith.constant 0 : index
    %c0_10 = arith.constant 0 : index
    %14 = vector.load %arg5[%c0_9, %c0_10] : memref<32x1024xbf16, #tpu.memory_space<vmem>>, vector<32x1024xbf16>
    %cst_11 = arith.constant dense<0.000000e+00> : vector<1x1024xf32>
    %15 = tpu.matmul %13, %14, %cst_11 {dimension_numbers = #tpu.dot_dimension_numbers<[1], [0], [0], [1], [0, 0, 1, 1], [], []>} : vector<1x32xbf16>, vector<32x1024xbf16>, vector<1x1024xf32> -> vector<1x1024xf32>
    %c0_12 = arith.constant 0 : index
    %c0_13 = arith.constant 0 : index
    %16 = vector.load %arg6[%c0_12, %c0_13] : memref<1x1024xf32, #tpu.memory_space<vmem>>, vector<1x1024xf32>
    %17 = arith.addf %15, %16 : vector<1x1024xf32>
    %18 = arith.truncf %17 : vector<1x1024xf32> to vector<1x1024xbf16>
    %c0_14 = arith.constant 0 : index
    %c0_15 = arith.constant 0 : index
    %19 = vector.load %arg7[%c0_14, %c0_15] : memref<1024x128xbf16, #tpu.memory_space<vmem>>, vector<1024x128xbf16>
    %cst_16 = arith.constant dense<0.000000e+00> : vector<1x128xf32>
    %20 = tpu.matmul %18, %19, %cst_16 {dimension_numbers = #tpu.dot_dimension_numbers<[1], [0], [0], [1], [0, 0, 1, 1], [], []>} : vector<1x1024xbf16>, vector<1024x128xbf16>, vector<1x128xf32> -> vector<1x128xf32>
    %c0_17 = arith.constant 0 : index
    %c0_18 = arith.constant 0 : index
    %c0_19 = arith.constant 0 : index
    %21 = vector.load %arg2[%c0_17, %c0_18, %c0_19] : memref<1x8x32xf32, #tpu.memory_space<vmem>>, vector<1x8x32xf32>
    %22 = vector.shape_cast %21 : vector<1x8x32xf32> to vector<8x32xf32>
    %23 = tpu.iota {dimensions = array<i32: 0>} : vector<8x8xi32>
    %24 = tpu.iota {dimensions = array<i32: 1>} : vector<8x8xi32>
    %25 = arith.cmpi sle, %24, %23 : vector<8x8xi32>
    %c0_20 = arith.constant 0 : index
    %c0_21 = arith.constant 0 : index
    %26 = vector.load %arg8[%c0_20, %c0_21] : memref<1x32xf32, #tpu.memory_space<vmem>>, vector<1x32xf32>
    %c0_22 = arith.constant 0 : index
    %c0_23 = arith.constant 0 : index
    %27 = vector.load %arg9[%c0_22, %c0_23] : memref<1x32xf32, #tpu.memory_space<vmem>>, vector<1x32xf32>
    %cst_24 = arith.constant dense<0.000000e+00> : vector<8xf32>
    %28 = vector.multi_reduction <add>, %22, %cst_24 [1] : vector<8x32xf32> to vector<8xf32>
    %29 = vector.shape_cast %28 : vector<8xf32> to vector<8x1xf32>
    %cst_25 = arith.constant 3.200000e+01 : f32
    %30 = vector.broadcast %cst_25 : f32 to vector<8x1xf32>
    %31 = arith.divf %29, %30 : vector<8x1xf32>
    %32 = vector.broadcast %31 : vector<8x1xf32> to vector<8x32xf32>
    %33 = arith.subf %22, %32 : vector<8x32xf32>
    %34 = arith.mulf %33, %33 : vector<8x32xf32>
    %cst_26 = arith.constant dense<0.000000e+00> : vector<8xf32>
    %35 = vector.multi_reduction <add>, %34, %cst_26 [1] : vector<8x32xf32> to vector<8xf32>
    %36 = vector.shape_cast %35 : vector<8xf32> to vector<8x1xf32>
    %cst_27 = arith.constant 3.200000e+01 : f32
    %37 = vector.broadcast %cst_27 : f32 to vector<8x1xf32>
    %38 = arith.divf %36, %37 : vector<8x1xf32>
    %39 = vector.broadcast %31 : vector<8x1xf32> to vector<8x32xf32>
    %40 = arith.subf %22, %39 : vector<8x32xf32>
    %cst_28 = arith.constant 9.99999974E-6 : f32
    %41 = vector.broadcast %cst_28 : f32 to vector<8x1xf32>
    %42 = arith.addf %38, %41 : vector<8x1xf32>
    %43 = math.rsqrt %42 : vector<8x1xf32>
    %44 = vector.broadcast %43 : vector<8x1xf32> to vector<8x32xf32>
    %45 = arith.mulf %40, %44 : vector<8x32xf32>
    %46 = vector.broadcast %26 : vector<1x32xf32> to vector<8x32xf32>
    %47 = arith.mulf %45, %46 : vector<8x32xf32>
    %48 = vector.broadcast %27 : vector<1x32xf32> to vector<8x32xf32>
    %49 = arith.addf %47, %48 : vector<8x32xf32>
    %50 = arith.truncf %49 : vector<8x32xf32> to vector<8x32xbf16>
    %c0_29 = arith.constant 0 : index
    %c0_30 = arith.constant 0 : index
    %51 = vector.load %arg10[%c0_29, %c0_30] : memref<32x96xbf16, #tpu.memory_space<vmem>>, vector<32x96xbf16>
    %cst_31 = arith.constant dense<0.000000e+00> : vector<8x96xf32>
    %52 = tpu.matmul %50, %51, %cst_31 {dimension_numbers = #tpu.dot_dimension_numbers<[1], [0], [0], [1], [0, 0, 1, 1], [], []>} : vector<8x32xbf16>, vector<32x96xbf16>, vector<8x96xf32> -> vector<8x96xf32>
    %c0_32 = arith.constant 0 : index
    %c0_33 = arith.constant 0 : index
    %53 = vector.load %arg11[%c0_32, %c0_33] : memref<1x96xf32, #tpu.memory_space<vmem>>, vector<1x96xf32>
    %54 = vector.broadcast %53 : vector<1x96xf32> to vector<8x96xf32>
    %55 = arith.addf %52, %54 : vector<8x96xf32>
    %56 = vector.extract_strided_slice %55 {offsets = [0, 0], sizes = [8, 16], strides = [1, 1]} : vector<8x96xf32> to vector<8x16xf32>
    %57 = vector.extract_strided_slice %55 {offsets = [0, 32], sizes = [8, 16], strides = [1, 1]} : vector<8x96xf32> to vector<8x16xf32>
    %58 = vector.extract_strided_slice %55 {offsets = [0, 64], sizes = [8, 16], strides = [1, 1]} : vector<8x96xf32> to vector<8x16xf32>
    %cst_34 = arith.constant 2.500000e-01 : f32
    %59 = vector.broadcast %cst_34 : f32 to vector<8x16xf32>
    %60 = arith.mulf %56, %59 : vector<8x16xf32>
    %61 = arith.truncf %60 : vector<8x16xf32> to vector<8x16xbf16>
    %62 = arith.truncf %57 : vector<8x16xf32> to vector<8x16xbf16>
    %cst_35 = arith.constant dense<0.000000e+00> : vector<8x8xf32>
    %63 = tpu.matmul %61, %62, %cst_35 {dimension_numbers = #tpu.dot_dimension_numbers<[1], [1], [0], [0], [0, 0, 1, 0], [], []>} : vector<8x16xbf16>, vector<8x16xbf16>, vector<8x8xf32> -> vector<8x8xf32>
    %cst_36 = arith.constant -1.000000e+30 : f32
    %64 = vector.broadcast %cst_36 : f32 to vector<8x8xf32>
    %65 = arith.select %25, %63, %64 : vector<8x8xi1>, vector<8x8xf32>
    %cst_37 = arith.constant dense<0xFF800000> : vector<8xf32>
    %66 = vector.multi_reduction <maximumf>, %65, %cst_37 [1] : vector<8x8xf32> to vector<8xf32>
    %67 = vector.shape_cast %66 : vector<8xf32> to vector<8x1xf32>
    %68 = vector.broadcast %67 : vector<8x1xf32> to vector<8x8xf32>
    %69 = arith.subf %65, %68 : vector<8x8xf32>
    %70 = math.exp %69 : vector<8x8xf32>
    %cst_38 = arith.constant dense<0.000000e+00> : vector<8xf32>
    %71 = vector.multi_reduction <add>, %70, %cst_38 [1] : vector<8x8xf32> to vector<8xf32>
    %72 = vector.shape_cast %71 : vector<8xf32> to vector<8x1xf32>
    %73 = vector.broadcast %72 : vector<8x1xf32> to vector<8x8xf32>
    %74 = arith.divf %70, %73 : vector<8x8xf32>
    %75 = arith.truncf %74 : vector<8x8xf32> to vector<8x8xbf16>
    %76 = arith.truncf %58 : vector<8x16xf32> to vector<8x16xbf16>
    %cst_39 = arith.constant dense<0.000000e+00> : vector<8x16xf32>
    %77 = tpu.matmul %75, %76, %cst_39 {dimension_numbers = #tpu.dot_dimension_numbers<[1], [0], [0], [1], [0, 0, 1, 1], [], []>} : vector<8x8xbf16>, vector<8x16xbf16>, vector<8x16xf32> -> vector<8x16xf32>
    %78 = vector.extract_strided_slice %55 {offsets = [0, 16], sizes = [8, 16], strides = [1, 1]} : vector<8x96xf32> to vector<8x16xf32>
    %79 = vector.extract_strided_slice %55 {offsets = [0, 48], sizes = [8, 16], strides = [1, 1]} : vector<8x96xf32> to vector<8x16xf32>
    %80 = vector.extract_strided_slice %55 {offsets = [0, 80], sizes = [8, 16], strides = [1, 1]} : vector<8x96xf32> to vector<8x16xf32>
    %cst_40 = arith.constant 2.500000e-01 : f32
    %81 = vector.broadcast %cst_40 : f32 to vector<8x16xf32>
    %82 = arith.mulf %78, %81 : vector<8x16xf32>
    %83 = arith.truncf %82 : vector<8x16xf32> to vector<8x16xbf16>
    %84 = arith.truncf %79 : vector<8x16xf32> to vector<8x16xbf16>
    %cst_41 = arith.constant dense<0.000000e+00> : vector<8x8xf32>
    %85 = tpu.matmul %83, %84, %cst_41 {dimension_numbers = #tpu.dot_dimension_numbers<[1], [1], [0], [0], [0, 0, 1, 0], [], []>} : vector<8x16xbf16>, vector<8x16xbf16>, vector<8x8xf32> -> vector<8x8xf32>
    %cst_42 = arith.constant -1.000000e+30 : f32
    %86 = vector.broadcast %cst_42 : f32 to vector<8x8xf32>
    %87 = arith.select %25, %85, %86 : vector<8x8xi1>, vector<8x8xf32>
    %cst_43 = arith.constant dense<0xFF800000> : vector<8xf32>
    %88 = vector.multi_reduction <maximumf>, %87, %cst_43 [1] : vector<8x8xf32> to vector<8xf32>
    %89 = vector.shape_cast %88 : vector<8xf32> to vector<8x1xf32>
    %90 = vector.broadcast %89 : vector<8x1xf32> to vector<8x8xf32>
    %91 = arith.subf %87, %90 : vector<8x8xf32>
    %92 = math.exp %91 : vector<8x8xf32>
    %cst_44 = arith.constant dense<0.000000e+00> : vector<8xf32>
    %93 = vector.multi_reduction <add>, %92, %cst_44 [1] : vector<8x8xf32> to vector<8xf32>
    %94 = vector.shape_cast %93 : vector<8xf32> to vector<8x1xf32>
    %95 = vector.broadcast %94 : vector<8x1xf32> to vector<8x8xf32>
    %96 = arith.divf %92, %95 : vector<8x8xf32>
    %97 = arith.truncf %96 : vector<8x8xf32> to vector<8x8xbf16>
    %98 = arith.truncf %80 : vector<8x16xf32> to vector<8x16xbf16>
    %cst_45 = arith.constant dense<0.000000e+00> : vector<8x16xf32>
    %99 = tpu.matmul %97, %98, %cst_45 {dimension_numbers = #tpu.dot_dimension_numbers<[1], [0], [0], [1], [0, 0, 1, 1], [], []>} : vector<8x8xbf16>, vector<8x16xbf16>, vector<8x16xf32> -> vector<8x16xf32>
    %100 = tpu.concatenate %77, %99 in 1 : vector<8x16xf32>, vector<8x16xf32> -> vector<8x32xf32>
    %101 = arith.truncf %100 : vector<8x32xf32> to vector<8x32xbf16>
    %c0_46 = arith.constant 0 : index
    %c0_47 = arith.constant 0 : index
    %102 = vector.load %arg12[%c0_46, %c0_47] : memref<32x32xbf16, #tpu.memory_space<vmem>>, vector<32x32xbf16>
    %cst_48 = arith.constant dense<0.000000e+00> : vector<8x32xf32>
    %103 = tpu.matmul %101, %102, %cst_48 {dimension_numbers = #tpu.dot_dimension_numbers<[1], [0], [0], [1], [0, 0, 1, 1], [], []>} : vector<8x32xbf16>, vector<32x32xbf16>, vector<8x32xf32> -> vector<8x32xf32>
    %c0_49 = arith.constant 0 : index
    %c0_50 = arith.constant 0 : index
    %104 = vector.load %arg13[%c0_49, %c0_50] : memref<1x32xf32, #tpu.memory_space<vmem>>, vector<1x32xf32>
    %105 = vector.broadcast %104 : vector<1x32xf32> to vector<8x32xf32>
    %106 = arith.addf %103, %105 : vector<8x32xf32>
    %107 = arith.addf %22, %106 : vector<8x32xf32>
    %c0_51 = arith.constant 0 : index
    %c0_52 = arith.constant 0 : index
    %108 = vector.load %arg14[%c0_51, %c0_52] : memref<1x32xf32, #tpu.memory_space<vmem>>, vector<1x32xf32>
    %c0_53 = arith.constant 0 : index
    %c0_54 = arith.constant 0 : index
    %109 = vector.load %arg15[%c0_53, %c0_54] : memref<1x32xf32, #tpu.memory_space<vmem>>, vector<1x32xf32>
    %cst_55 = arith.constant dense<0.000000e+00> : vector<8xf32>
    %110 = vector.multi_reduction <add>, %107, %cst_55 [1] : vector<8x32xf32> to vector<8xf32>
    %111 = vector.shape_cast %110 : vector<8xf32> to vector<8x1xf32>
    %cst_56 = arith.constant 3.200000e+01 : f32
    %112 = vector.broadcast %cst_56 : f32 to vector<8x1xf32>
    %113 = arith.divf %111, %112 : vector<8x1xf32>
    %114 = vector.broadcast %113 : vector<8x1xf32> to vector<8x32xf32>
    %115 = arith.subf %107, %114 : vector<8x32xf32>
    %116 = arith.mulf %115, %115 : vector<8x32xf32>
    %cst_57 = arith.constant dense<0.000000e+00> : vector<8xf32>
    %117 = vector.multi_reduction <add>, %116, %cst_57 [1] : vector<8x32xf32> to vector<8xf32>
    %118 = vector.shape_cast %117 : vector<8xf32> to vector<8x1xf32>
    %cst_58 = arith.constant 3.200000e+01 : f32
    %119 = vector.broadcast %cst_58 : f32 to vector<8x1xf32>
    %120 = arith.divf %118, %119 : vector<8x1xf32>
    %121 = vector.broadcast %113 : vector<8x1xf32> to vector<8x32xf32>
    %122 = arith.subf %107, %121 : vector<8x32xf32>
    %cst_59 = arith.constant 9.99999974E-6 : f32
    %123 = vector.broadcast %cst_59 : f32 to vector<8x1xf32>
    %124 = arith.addf %120, %123 : vector<8x1xf32>
    %125 = math.rsqrt %124 : vector<8x1xf32>
    %126 = vector.broadcast %125 : vector<8x1xf32> to vector<8x32xf32>
    %127 = arith.mulf %122, %126 : vector<8x32xf32>
    %128 = vector.broadcast %108 : vector<1x32xf32> to vector<8x32xf32>
    %129 = arith.mulf %127, %128 : vector<8x32xf32>
    %130 = vector.broadcast %109 : vector<1x32xf32> to vector<8x32xf32>
    %131 = arith.addf %129, %130 : vector<8x32xf32>
    %132 = arith.truncf %131 : vector<8x32xf32> to vector<8x32xbf16>
    %c0_60 = arith.constant 0 : index
    %c0_61 = arith.constant 0 : index
    %133 = vector.load %arg16[%c0_60, %c0_61] : memref<32x128xbf16, #tpu.memory_space<vmem>>, vector<32x128xbf16>
    %cst_62 = arith.constant dense<0.000000e+00> : vector<8x128xf32>
    %134 = tpu.matmul %132, %133, %cst_62 {dimension_numbers = #tpu.dot_dimension_numbers<[1], [0], [0], [1], [0, 0, 1, 1], [], []>} : vector<8x32xbf16>, vector<32x128xbf16>, vector<8x128xf32> -> vector<8x128xf32>
    %c0_63 = arith.constant 0 : index
    %c0_64 = arith.constant 0 : index
    %135 = vector.load %arg17[%c0_63, %c0_64] : memref<1x128xf32, #tpu.memory_space<vmem>>, vector<1x128xf32>
    %136 = vector.broadcast %135 : vector<1x128xf32> to vector<8x128xf32>
    %137 = arith.addf %134, %136 : vector<8x128xf32>
    %138 = arith.mulf %137, %137 : vector<8x128xf32>
    %139 = arith.mulf %137, %138 : vector<8x128xf32>
    %cst_65 = arith.constant 4.471500e-02 : f32
    %140 = vector.broadcast %cst_65 : f32 to vector<8x128xf32>
    %141 = arith.mulf %140, %139 : vector<8x128xf32>
    %142 = arith.addf %137, %141 : vector<8x128xf32>
    %cst_66 = arith.constant 0.797884583 : f32
    %143 = vector.broadcast %cst_66 : f32 to vector<8x128xf32>
    %144 = arith.mulf %143, %142 : vector<8x128xf32>
    %145 = math.tanh %144 : vector<8x128xf32>
    %cst_67 = arith.constant 1.000000e+00 : f32
    %146 = vector.broadcast %cst_67 : f32 to vector<8x128xf32>
    %147 = arith.addf %146, %145 : vector<8x128xf32>
    %cst_68 = arith.constant 5.000000e-01 : f32
    %148 = vector.broadcast %cst_68 : f32 to vector<8x128xf32>
    %149 = arith.mulf %148, %147 : vector<8x128xf32>
    %150 = arith.mulf %137, %149 : vector<8x128xf32>
    %151 = arith.truncf %150 : vector<8x128xf32> to vector<8x128xbf16>
    %c0_69 = arith.constant 0 : index
    %c0_70 = arith.constant 0 : index
    %152 = vector.load %arg18[%c0_69, %c0_70] : memref<128x32xbf16, #tpu.memory_space<vmem>>, vector<128x32xbf16>
    %cst_71 = arith.constant dense<0.000000e+00> : vector<8x32xf32>
    %153 = tpu.matmul %151, %152, %cst_71 {dimension_numbers = #tpu.dot_dimension_numbers<[1], [0], [0], [1], [0, 0, 1, 1], [], []>} : vector<8x128xbf16>, vector<128x32xbf16>, vector<8x32xf32> -> vector<8x32xf32>
    %c0_72 = arith.constant 0 : index
    %c0_73 = arith.constant 0 : index
    %154 = vector.load %arg19[%c0_72, %c0_73] : memref<1x32xf32, #tpu.memory_space<vmem>>, vector<1x32xf32>
    %155 = vector.broadcast %154 : vector<1x32xf32> to vector<8x32xf32>
    %156 = arith.addf %153, %155 : vector<8x32xf32>
    %157 = arith.addf %107, %156 : vector<8x32xf32>
    %c0_74 = arith.constant 0 : index
    %c0_75 = arith.constant 0 : index
    %158 = vector.load %arg20[%c0_74, %c0_75] : memref<1x32xf32, #tpu.memory_space<vmem>>, vector<1x32xf32>
    %c0_76 = arith.constant 0 : index
    %c0_77 = arith.constant 0 : index
    %159 = vector.load %arg21[%c0_76, %c0_77] : memref<1x32xf32, #tpu.memory_space<vmem>>, vector<1x32xf32>
    %cst_78 = arith.constant dense<0.000000e+00> : vector<8xf32>
    %160 = vector.multi_reduction <add>, %157, %cst_78 [1] : vector<8x32xf32> to vector<8xf32>
    %161 = vector.shape_cast %160 : vector<8xf32> to vector<8x1xf32>
    %cst_79 = arith.constant 3.200000e+01 : f32
    %162 = vector.broadcast %cst_79 : f32 to vector<8x1xf32>
    %163 = arith.divf %161, %162 : vector<8x1xf32>
    %164 = vector.broadcast %163 : vector<8x1xf32> to vector<8x32xf32>
    %165 = arith.subf %157, %164 : vector<8x32xf32>
    %166 = arith.mulf %165, %165 : vector<8x32xf32>
    %cst_80 = arith.constant dense<0.000000e+00> : vector<8xf32>
    %167 = vector.multi_reduction <add>, %166, %cst_80 [1] : vector<8x32xf32> to vector<8xf32>
    %168 = vector.shape_cast %167 : vector<8xf32> to vector<8x1xf32>
    %cst_81 = arith.constant 3.200000e+01 : f32
    %169 = vector.broadcast %cst_81 : f32 to vector<8x1xf32>
    %170 = arith.divf %168, %169 : vector<8x1xf32>
    %171 = vector.broadcast %163 : vector<8x1xf32> to vector<8x32xf32>
    %172 = arith.subf %157, %171 : vector<8x32xf32>
    %cst_82 = arith.constant 9.99999974E-6 : f32
    %173 = vector.broadcast %cst_82 : f32 to vector<8x1xf32>
    %174 = arith.addf %170, %173 : vector<8x1xf32>
    %175 = math.rsqrt %174 : vector<8x1xf32>
    %176 = vector.broadcast %175 : vector<8x1xf32> to vector<8x32xf32>
    %177 = arith.mulf %172, %176 : vector<8x32xf32>
    %178 = vector.broadcast %158 : vector<1x32xf32> to vector<8x32xf32>
    %179 = arith.mulf %177, %178 : vector<8x32xf32>
    %180 = vector.broadcast %159 : vector<1x32xf32> to vector<8x32xf32>
    %181 = arith.addf %179, %180 : vector<8x32xf32>
    %182 = arith.truncf %181 : vector<8x32xf32> to vector<8x32xbf16>
    %c0_83 = arith.constant 0 : index
    %c0_84 = arith.constant 0 : index
    %183 = vector.load %arg22[%c0_83, %c0_84] : memref<32x128xbf16, #tpu.memory_space<vmem>>, vector<32x128xbf16>
    %cst_85 = arith.constant dense<0.000000e+00> : vector<8x128xf32>
    %184 = tpu.matmul %182, %183, %cst_85 {dimension_numbers = #tpu.dot_dimension_numbers<[1], [0], [0], [1], [0, 0, 1, 1], [], []>} : vector<8x32xbf16>, vector<32x128xbf16>, vector<8x128xf32> -> vector<8x128xf32>
    %185 = vector.broadcast %20 : vector<1x128xf32> to vector<8x128xf32>
    %186 = arith.addf %184, %185 : vector<8x128xf32>
    %c0_86 = arith.constant 0 : index
    %c0_87 = arith.constant 0 : index
    %187 = vector.load %arg23[%c0_86, %c0_87] : memref<1x128xf32, #tpu.memory_space<vmem>>, vector<1x128xf32>
    %188 = vector.broadcast %187 : vector<1x128xf32> to vector<8x128xf32>
    %189 = arith.addf %186, %188 : vector<8x128xf32>
    %190 = vector.shape_cast %189 : vector<8x128xf32> to vector<1x8x128xf32>
    %c0_88 = arith.constant 0 : index
    %c0_89 = arith.constant 0 : index
    %c0_90 = arith.constant 0 : index
    %191 = vector.load %arg24[%c0_88, %c0_89, %c0_90] : memref<1x8x128xf32, #tpu.memory_space<vmem>>, vector<1x8x128xf32>
    tpu.vector_store %arg24[%c0_88, %c0_89, %c0_90], %190 {strides = array<i32>} : memref<1x8x128xf32, #tpu.memory_space<vmem>>, vector<1x8x128xf32>,
    return
  }
  func.func @transform_0(%arg0: i32) -> (i32, i32, i32) {
    %c0_i32 = arith.constant 0 : i32
    %c0_i32_0 = arith.constant 0 : i32
    %c0_i32_1 = arith.constant 0 : i32
    return %arg0, %c0_i32, %c0_i32_0 : i32, i32, i32
  }
  func.func @transform_1(%arg0: i32) -> (i32, i32, i32) {
    %c0_i32 = arith.constant 0 : i32
    %c0_i32_0 = arith.constant 0 : i32
    %c0_i32_1 = arith.constant 0 : i32
    return %arg0, %c0_i32, %c0_i32_0 : i32, i32, i32
  }
  func.func @transform_2(%arg0: i32) -> (i32, i32) {
    %c0_i32 = arith.constant 0 : i32
    %c0_i32_0 = arith.constant 0 : i32
    %c0_i32_1 = arith.constant 0 : i32
    return %c0_i32, %c0_i32_0 : i32, i32
  }
  func.func @transform_3(%arg0: i32) -> (i32, i32) {
    %c0_i32 = arith.constant 0 : i32
    %c0_i32_0 = arith.constant 0 : i32
    %c0_i32_1 = arith.constant 0 : i32
    return %c0_i32, %c0_i32_0 : i32, i32
  }
  func.func @transform_4(%arg0: i32) -> (i32, i32) {
    %c0_i32 = arith.constant 0 : i32
    %c0_i32_0 = arith.constant 0 : i32
    %c0_i32_1 = arith.constant 0 : i32
    return %c0_i32, %c0_i32_0 : i32, i32
  }
  func.func @transform_5(%arg0: i32) -> (i32, i32) {
    %c0_i32 = arith.constant 0 : i32
    %c0_i32_0 = arith.constant 0 : i32
    %c0_i32_1 = arith.constant 0 : i32
    return %c0_i32, %c0_i32_0 : i32, i32
  }
  func.func @transform_6(%arg0: i32) -> (i32, i32) {
    %c0_i32 = arith.constant 0 : i32
    %c0_i32_0 = arith.constant 0 : i32
    %c0_i32_1 = arith.constant 0 : i32
    return %c0_i32, %c0_i32_0 : i32, i32
  }
  func.func @transform_7(%arg0: i32) -> (i32, i32) {
    %c0_i32 = arith.constant 0 : i32
    %c0_i32_0 = arith.constant 0 : i32
    %c0_i32_1 = arith.constant 0 : i32
    return %c0_i32, %c0_i32_0 : i32, i32
  }
  func.func @transform_8(%arg0: i32) -> (i32, i32) {
    %c0_i32 = arith.constant 0 : i32
    %c0_i32_0 = arith.constant 0 : i32
    %c0_i32_1 = arith.constant 0 : i32
    return %c0_i32, %c0_i32_0 : i32, i32
  }
  func.func @transform_9(%arg0: i32) -> (i32, i32) {
    %c0_i32 = arith.constant 0 : i32
    %c0_i32_0 = arith.constant 0 : i32
    %c0_i32_1 = arith.constant 0 : i32
    return %c0_i32, %c0_i32_0 : i32, i32
  }
  func.func @transform_10(%arg0: i32) -> (i32, i32) {
    %c0_i32 = arith.constant 0 : i32
    %c0_i32_0 = arith.constant 0 : i32
    %c0_i32_1 = arith.constant 0 : i32
    return %c0_i32, %c0_i32_0 : i32, i32
  }
  func.func @transform_11(%arg0: i32) -> (i32, i32) {
    %c0_i32 = arith.constant 0 : i32
    %c0_i32_0 = arith.constant 0 : i32
    %c0_i32_1 = arith.constant 0 : i32
    return %c0_i32, %c0_i32_0 : i32, i32
  }
  func.func @transform_12(%arg0: i32) -> (i32, i32) {
    %c0_i32 = arith.constant 0 : i32
    %c0_i32_0 = arith.constant 0 : i32
    %c0_i32_1 = arith.constant 0 : i32
    return %c0_i32, %c0_i32_0 : i32, i32
  }
  func.func @transform_13(%arg0: i32) -> (i32, i32) {
    %c0_i32 = arith.constant 0 : i32
    %c0_i32_0 = arith.constant 0 : i32
    %c0_i32_1 = arith.constant 0 : i32
    return %c0_i32, %c0_i32_0 : i32, i32
  }
  func.func @transform_14(%arg0: i32) -> (i32, i32) {
    %c0_i32 = arith.constant 0 : i32
    %c0_i32_0 = arith.constant 0 : i32
    %c0_i32_1 = arith.constant 0 : i32
    return %c0_i32, %c0_i32_0 : i32, i32
  }
  func.func @transform_15(%arg0: i32) -> (i32, i32) {
    %c0_i32 = arith.constant 0 : i32
    %c0_i32_0 = arith.constant 0 : i32
    %c0_i32_1 = arith.constant 0 : i32
    return %c0_i32, %c0_i32_0 : i32, i32
  }
  func.func @transform_16(%arg0: i32) -> (i32, i32) {
    %c0_i32 = arith.constant 0 : i32
    %c0_i32_0 = arith.constant 0 : i32
    %c0_i32_1 = arith.constant 0 : i32
    return %c0_i32, %c0_i32_0 : i32, i32
  }
  func.func @transform_17(%arg0: i32) -> (i32, i32) {
    %c0_i32 = arith.constant 0 : i32
    %c0_i32_0 = arith.constant 0 : i32
    %c0_i32_1 = arith.constant 0 : i32
    return %c0_i32, %c0_i32_0 : i32, i32
  }
  func.func @transform_18(%arg0: i32) -> (i32, i32) {
    %c0_i32 = arith.constant 0 : i32
    %c0_i32_0 = arith.constant 0 : i32
    %c0_i32_1 = arith.constant 0 : i32
    return %c0_i32, %c0_i32_0 : i32, i32
  }
  func.func @transform_19(%arg0: i32) -> (i32, i32) {
    %c0_i32 = arith.constant 0 : i32
    %c0_i32_0 = arith.constant 0 : i32
    %c0_i32_1 = arith.constant 0 : i32
    return %c0_i32, %c0_i32_0 : i32, i32
  }
  func.func @transform_20(%arg0: i32) -> (i32, i32) {
    %c0_i32 = arith.constant 0 : i32
    %c0_i32_0 = arith.constant 0 : i32
    %c0_i32_1 = arith.constant 0 : i32
    return %c0_i32, %c0_i32_0 : i32, i32
  }
  func.func @transform_21(%arg0: i32) -> (i32, i32) {
    %c0_i32 = arith.constant 0 : i32
    %c0_i32_0 = arith.constant 0 : i32
    %c0_i32_1 = arith.constant 0 : i32
    return %c0_i32, %c0_i32_0 : i32, i32
  }
  func.func @transform_22(%arg0: i32) -> (i32, i32) {
    %c0_i32 = arith.constant 0 : i32
    %c0_i32_0 = arith.constant 0 : i32
    %c0_i32_1 = arith.constant 0 : i32
    return %c0_i32, %c0_i32_0 : i32, i32
  }
  func.func @transform_23(%arg0: i32) -> (i32, i32, i32) {
    %c0_i32 = arith.constant 0 : i32
    %c0_i32_0 = arith.constant 0 : i32
    %c0_i32_1 = arith.constant 0 : i32
    return %arg0, %c0_i32, %c0_i32_0 : i32, i32, i32
  }
}

</mosaic_0001>

<bundles_post_ra>
// kernel: resnet_gpt2_forward.1
= control target key start
LH: loop header
LB: loop body
LE: loop exit
PB: predicated region body
PF: predicated region fallthrough
CT: control target
= control target key end

     0   :  { %s4417_s0 = inlined_call_operand.vmem [shape: bf16[2,256,36], index: 0, kind: input, shape index: {}]   ;;  %s4418_s1 = inlined_call_operand.vmem [shape: f32[2,8,32], index: 1, kind: input, shape index: {}]   ;;  %s4419_s2 = inlined_call_operand.vmem [shape: bf16[36,32], index: 2, kind: input, shape index: {}]   ;;  %s4420_s3 = inlined_call_operand.vmem [shape: f32[1,32], index: 3, kind: input, shape index: {}]   ;;  %s4421_s4 = inlined_call_operand.vmem [shape: bf16[32,1024], index: 4, kind: input, shape index: {}]   ;;  %s4422_s5 = inlined_call_operand.vmem [shape: f32[1,1024], index: 5, kind: input, shape index: {}]   ;;  %s4423_s6 = inlined_call_operand.vmem [shape: bf16[1024,128], index: 6, kind: input, shape index: {}]   ;;  %s4424_s7 = inlined_call_operand.vmem [shape: f32[1,32], index: 7, kind: input, shape index: {}]   ;;  %s4425_s8 = inlined_call_operand.vmem [shape: f32[1,32], index: 8, kind: input, shape index: {}]   ;;  %s4426_s9 = inlined_call_operand.vmem [shape: bf16[32,96], index: 9, kind: input, shape index: {}]   ;;  %s4427_s10 = inlined_call_operand.vmem [shape: f32[1,96], index: 10, kind: input, shape index: {}]   ;;  %s4428_s11 = inlined_call_operand.vmem [shape: bf16[32,32], index: 11, kind: input, shape index: {}]   ;;  %s4429_s12 = inlined_call_operand.vmem [shape: f32[1,32], index: 12, kind: input, shape index: {}]   ;;  %s4430_s13 = inlined_call_operand.vmem [shape: f32[1,32], index: 13, kind: input, shape index: {}]   ;;  %s4431_s14 = inlined_call_operand.vmem [shape: f32[1,32], index: 14, kind: input, shape index: {}]   ;;  %s4432_s15 = inlined_call_operand.vmem [shape: bf16[32,128], index: 15, kind: input, shape index: {}]   ;;  %s4433_s16 = inlined_call_operand.vmem [shape: f32[1,128], index: 16, kind: input, shape index: {}]   ;;  %s4434_s17 = inlined_call_operand.vmem [shape: bf16[128,32], index: 17, kind: input, shape index: {}]   ;;  %s4435_s18 = inlined_call_operand.vmem [shape: f32[1,32], index: 18, kind: input, shape index: {}]   ;;  %s4436_s19 = inlined_call_operand.vmem [shape: f32[1,32], index: 19, kind: input, shape index: {}]   ;;  %s4437_s20 = inlined_call_operand.vmem [shape: f32[1,32], index: 20, kind: input, shape index: {}]   ;;  %s4438_s21 = inlined_call_operand.vmem [shape: bf16[32,128], index: 21, kind: input, shape index: {}]   ;;  %s4439_s22 = inlined_call_operand.vmem [shape: f32[1,128], index: 22, kind: input, shape index: {}]   ;;  %s4440_s23 = inlined_call_operand.hbm [shape: f32[2,8,128], index: 23, kind: output, shape index: {}]  }
   0x1   :  { %4455 = sst [smem:[#allocation12_spill]] %s4417_s0 }
   0x2   :  { %4456 = sst [smem:[#allocation13_spill]] %s4418_s1 }
   0x3   :  { %4457 = sst [smem:[#allocation14_spill]] %s4419_s2 }
   0x4   :  { %4458 = sst [smem:[#allocation15_spill]] %s4420_s3 }
   0x5   :  { %4459 = sst [smem:[#allocation16_spill]] %s4421_s4 }
   0x6   :  { %4460 = sst [smem:[#allocation17_spill]] %s4422_s5 }
   0x7   :  { %4461 = sst [smem:[#allocation18_spill]] %s4423_s6 }
   0x8   :  { %4462 = sst [smem:[#allocation19_spill]] %s4424_s7 }
   0x9   :  { %4463 = sst [smem:[#allocation20_spill]] %s4440_s23 }
   0xa   :  { %28 = vsyncpa [#allocation3], 0 }
   0xb   :  { %30 = vsyncpa [#allocation3 + $0x1], 0  ;;  %s3756_s4 = smov 0   ;;  %s3758_s30 = smov 0  }
   0xc   :  { %s3760_s24 = smov 0   ;;  %s3762_s25 = smov 0  }
   0xd LB: > { %4464 = sst [smem:[#allocation5_spill]] %s3612_s4  ;;  %s3777_s5 = sadd.s32 4294967295, %s3624_s25   ;;  %s3624_s25 = sphi %s3762_s25, %s4487_s25   ;;  %s3620_s24 = sphi %s3760_s24, %s4489_s24   ;;  %s3616_s30 = sphi %s3758_s30, %s4491_s30   ;;  %s3612_s4 = sphi %s3756_s4, %s4490_s4  }
   0xe   : > { %4465 = sst [smem:[#allocation6_spill]] %s3620_s24  ;;  %s2979_s1 = sadd.s32 4294967294, %s3624_s25  }
   0xf   : > { %4466 = sst [smem:[#allocation7_spill]] %s3624_s25  ;;  %s3781_s26 = sadd.s32 1, %s3624_s25  }
  0x10   : > { %4467 = sst [smem:[#allocation8_spill]] %s3781_s26  ;;  %s536_s2 = sadd.s32 1, %s3620_s24 }
  0x11   : > { %s533_s6 = ssub.s32 %s3624_s25, %s3781_s26  ;;  %p546_p0 = scmp.ne.s32.totalorder %s3620_s24, %s3616_s30 }
  0x12   : > { %p534_p1 = scmp.eq.s32.totalorder %s533_s6, 0  ;;  %p547_p2 = scmp.eq.s32.totalorder %s3777_s5, 1 }
  0x13   : > { %p552_p3 = scmp.ne.s32.totalorder %s3616_s30, %s3612_s4  ;;  %p553_p4 = scmp.eq.s32.totalorder %s2979_s1, 1 }
  0x14   : > { %s3792_s27 = scalar_select %p534_p1, %s3620_s24, %s536_s2  }
  0x15   : > { %p3794_p5 = por %p547_p2, %p546_p0  ;;  %p3798_p6 = por %p553_p4, %p552_p3 }
  0x16   : > { %4468 = sst [smem:[#allocation9_spill]] %s3792_s27  ;;  %p2982_p7 = scmp.ge.s32.totalorder %s3624_s25, 1 }
  0x17   : > { %s4469_s7 = scalar_select %p3794_p5, 1, 0 }
  0x18   : > { %s4471_s28 = scalar_select %p3798_p6, 1, 0 }
  0x19   : > { %4470 = sst [smem:[#allocation10_spill]] %s4469_s7  ;;  %p649_p8 = scmp.lt.s32.totalorder %s3624_s25, 3 }
  0x1a   : > { %4472 = sst [smem:[#allocation11_spill]] %s4471_s28 }
  0x1b   : > { %p650_p9 = pnand %p2982_p7, %p649_p8 }
  0x1c   : > { %s4473_s0 = sld [smem:[#allocation14_spill]] (!%p650_p9)  ;;  %p717_p10 = scmp.lt.s32.totalorder (!%p650_p9), %s3777_s5, 1  ;;  %vm915_vm0 = vcmask (!%p650_p9), 1041408   ;;  %vm866_vm1 = vcmask (!%p650_p9), 293888   ;;  %vm1112_vm2 = vcmask (!%p650_p9), 261120   ;;  %v3626_v33 = vmov (!%p650_p9), 0  }
  0x1d   : > { %653 = sbr.rel (%p650_p9) target bundleno = 3353 (0xd19), region = 112  ;;  %s4474_s28 = sld [smem:[#allocation12_spill]] (!%p650_p9)  ;;  %1358 = vmatprep.mubr.bf16.mxu1 (!%p650_p9), %v3626_v33  ;;  %vm3628_vm3 = vmmov (!%p650_p9), 0   ;;  %vm2279_vm4 = vcmask (!%p650_p9), 130048   ;;  %vm2327_vm6 = vcmask (!%p650_p9), 64512   ;;  %vm2345_vm7 = vcmask (!%p650_p9), 1043456  }
  0x1e   : > { %s4475_s1 = sld [smem:[#allocation13_spill]] (!%p650_p9)  ;;  %s4476_s29 = sld [smem:[#allocation16_spill]] (!%p650_p9) }
  0x1f   : > { %s4480_s6 = sld [smem:[#allocation17_spill]] (!%p650_p9)  ;;  %s4481_s25 = sld [smem:[#allocation19_spill]] (!%p650_p9) }
  0x20   : > { %s4483_s27 = sld [smem:[#allocation20_spill]] (!%p650_p9) }
  0x22   : > { %v3446_v0 = vld [vmem:[%s4473_s0] sm:$0xff] (!%p650_p9)   ;;  %v3447_v1 = vld [vmem:[%s4473_s0 + $0x8] sm:$0xff] (!%p650_p9)   ;;  %v3448_v2 = vld [vmem:[%s4473_s0 + $0x10] ss:$0 sps:$4 sm:$0x33] (!%p650_p9)   ;;  %s3630_s0 = smov (!%p650_p9), 112  }
  0x23   : > { %3283 = vmatprep.subr.bf16.mxu0 (!%p650_p9), %v3446_v0  ;;  %v917_v4 = vsel (!%p650_p9), %vm915_vm0, %v3448_v2, 0 }
  0x24   : > { %3284 = vmatpush3.bf16.msra.mxu0 %v3446_v0  ;;  %s718_s24 = scalar_select %p717_p10, %s3777_s5, 1  ;;  %v1185_v26 = vld [vmem:[%s4476_s29] sm:$0xff]  ;;  %v3880_v36 = vld [vmem:[%s4476_s29 + $0x8] sm:$0xff] }
  0x25   : > { %3285 = vmatprep.subr.bf16.mxu0 %v3447_v1  ;;  %v1189_v27 = vld [vmem:[%s4476_s29 + $0x20] sm:$0xff]  ;;  %v3885_v37 = vld [vmem:[%s4476_s29 + $0x28] sm:$0xff] }
  0x26   : > { %s3146_s26 = sshll.u32 %s718_s24, 7  ;;  %v1193_v28 = vld [vmem:[%s4476_s29 + $0x40] sm:$0xff]  ;;  %v3024_v30 = vcombine.high %v1185_v26, %v1189_v27  ;;  %v3023_v31 = vcombine.low %v1185_v26, %v1189_v27  ;;  %v3026_v38 = vcombine.high %v3880_v36, %v3885_v37  ;;  %v3025_v39 = vcombine.low %v3880_v36, %v3885_v37  ;;  %v1188_v36 = vld [vmem:[%s4476_s29 + $0x18] sm:$0xff] }
  0x27   : > { %s3818_s4 = scalar_lea.vmem %s4474_s28, %s3146_s26  ;;  %s2986_s26 = sshll.u32 %s718_s24, 3  ;;  %v1197_v32 = vld [vmem:[%s4476_s29 + $0x60] sm:$0xff]  ;;  %v1192_v37 = vld [vmem:[%s4476_s29 + $0x38] sm:$0xff] }
  0x28   : > { %3286 = vmatpush3.bf16.msra.mxu0 %v3447_v1  ;;  %v3449_v3 = vld [vmem:[%s3818_s4] sm:$0xff]   ;;  %v3450_v5 = vld [vmem:[%s3818_s4 + $0x8] sm:$0xff]   ;;  %v3451_v6 = vld [vmem:[%s3818_s4 + $0x10] sm:$0xff]   ;;  %s3831_s2 = scalar_lea.vmem %s4475_s1, %s2986_s26  ;;  %v3032_v34 = vcombine.high %v1193_v28, %v1197_v32  ;;  %1326 = vmatprep.subr.bf16.mxu1 %v3024_v30  ;;  %v3031_v35 = vcombine.low %v1193_v28, %v1197_v32  ;;  %s4479_s28 = sld [smem:[#allocation15_spill]] }
  0x29   : > { %3397 = vmatprep.subr.msk.bf16.mxu0 %vm915_vm0, %v3448_v2  ;;  %3289 = vmatprep.mubr.msk.bf16.mxu0 %vm866_vm1, %v3449_v3  ;;  %v3452_v7 = vld [vmem:[%s3818_s4 + $0x18] sm:$0xff]   ;;  %v3453_v8 = vld [vmem:[%s3818_s4 + $0x20] sm:$0xff]   ;;  %v3454_v10 = vld [vmem:[%s3818_s4 + $0x28] sm:$0xff]   ;;  %s3633_s24 = smov 64   ;;  %s3634_s26 = smov 16  }
  0x2a   : > { %v2170_v9 = vld [vmem:[%s3831_s2] sm:$0xff]  ;;  %v3455_v12 = vld [vmem:[%s3818_s4 + $0x30] sm:$0xff]   ;;  %v3456_v13 = vld [vmem:[%s3818_s4 + $0x38] sm:$0xff]   ;;  %1327 = vmatpush1.bf16.msra.mxu1 %v3023_v31 }
  0x2b   : > { %v2178_v11 = vsel %vm1112_vm2, %v2170_v9, 0.0  ;;  %v3457_v14 = vld [vmem:[%s3818_s4 + $0x40] sm:$0xff]   ;;  %v3458_v15 = vld [vmem:[%s3818_s4 + $0x48] sm:$0xff]   ;;  %v3459_v16 = vld [vmem:[%s3818_s4 + $0x50] sm:$0xff]   ;;  %1328 = vmatprep.subr.bf16.mxu1 %v3032_v34 }
  0x2c   : > { %3288 = vmatpush3.bf16.msra.mxu0 %v917_v4  ;;  %2179 = vadd.xlane.f32.xlu0 %v2178_v11  ;;  %v3460_v17 = vld [vmem:[%s3818_s4 + $0x58] sm:$0xff]   ;;  %v3461_v18 = vld [vmem:[%s3818_s4 + $0x60] sm:$0xff]   ;;  %v3462_v19 = vld [vmem:[%s3818_s4 + $0x68] sm:$0xff]  }
  0x2d   : > { %v3463_v20 = vld [vmem:[%s3818_s4 + $0x70] sm:$0xff]   ;;  %v3464_v21 = vld [vmem:[%s3818_s4 + $0x78] sm:$0xff]   ;;  %s4477_s4 = sld [smem:[#allocation18_spill]] }
  0x2e   : > { %1329 = vmatpush1.bf16.msra.mxu1 %v3031_v35  ;;  %v3924_v50 = vld [vmem:[%s4479_s28] ss:$0 sm:$0xff]  ;;  %s3629_s28 = smov 96  }
  0x2f   : > { %3290 = vmatmul.mubr.msk.bf16.vlgmr.msra.gmra.mrb[0].mxu0 %vm866_vm1, %v3450_v5  ;;  %1367 = vmatprep.subr.bf16.mxu1 %v3026_v38 }
  0x30   : > { %3293 = vmatprep.mubr.msk.bf16.mxu0 %vm866_vm1, %v3451_v6 }
  0x33   : > { %s4478_s1 = smov %s4477_s4  ;;  %v3465_v40 = vld [vmem:[%s4477_s4 + $0xc0] sm:$0xff]   ;;  %s3632_s4 = smov 48  }
  0x34   : > { %v3466_v41 = vld [vmem:[%s4478_s1 + $0x80] sm:$0xff]   ;;  %v3467_v42 = vld [vmem:[%s4478_s1 + $0xc8] sm:$0xff]   ;;  %3188 = vmatprep.subr.bf16.mxu0 %v3465_v40  ;;  %v3469_v44 = vld [vmem:[%s4478_s1 + $0xd0] sm:$0xff]  }
  0x35   : > { %3189 = vmatpush3.bf16.msra.mxu0 %v3466_v41  ;;  %v3468_v43 = vld [vmem:[%s4478_s1 + $0x88] sm:$0xff]   ;;  %v3470_v45 = vld [vmem:[%s4478_s1 + $0x90] sm:$0xff]   ;;  %v3475_v46 = vld [vmem:[%s4478_s1 + $0xd8] sm:$0xff]  }
  0x36   : > { %3190 = vmatprep.subr.bf16.mxu0 %v3467_v42  ;;  %v3476_v47 = vld [vmem:[%s4478_s1 + $0x98] sm:$0xff]   ;;  %v3481_v48 = vld [vmem:[%s4478_s1 + $0xe0] sm:$0xff]   ;;  %v3487_v60 = vld [vmem:[%s4478_s1 + $0xe8] sm:$0xff]  }
  0x37   : > { %3294 = vmatmul.mubr.msk.bf16.gmra.mrb[4].mxu0 %vm866_vm1, %v3452_v7  ;;  %v3482_v49 = vld [vmem:[%s4478_s1 + $0xa0] sm:$0xff]   ;;  %v3488_v61 = vld [vmem:[%s4478_s1 + $0xa8] sm:$0xff]  }
  0x38   : > { %3297 = vmatprep.mubr.msk.bf16.mxu0 %vm866_vm1, %v3453_v8 }
  0x39   : > { %3191 = vmatpush3.bf16.msra.mxu0 %v3468_v43 }
  0x3a   : > { %3192 = vmatprep.subr.bf16.mxu0 %v3469_v44 }
  0x3d   : > { %3193 = vmatpush3.bf16.msra.mxu0 %v3470_v45 }
  0x3e   : > { %3194 = vmatprep.subr.bf16.mxu0 %v3475_v46 }
  0x3f   : > { %3298 = vmatmul.mubr.msk.bf16.gmra.mrb[8].mxu0 %vm866_vm1, %v3454_v10 }
  0x40   : > { %3301 = vmatprep.mubr.msk.bf16.mxu0 %vm866_vm1, %v3455_v12 }
  0x41   : > { %3195 = vmatpush3.bf16.msra.mxu0 %v3476_v47 }
  0x42   : > { %3196 = vmatprep.subr.bf16.mxu0 %v3481_v48 }
  0x45   : > { %3197 = vmatpush3.bf16.msra.mxu0 %v3482_v49 }
  0x46   : > { %3198 = vmatprep.subr.bf16.mxu0 %v3487_v60 }
  0x47   : > { %3302 = vmatmul.mubr.msk.bf16.gmra.mrb[12].mxu0 %vm866_vm1, %v3456_v13 }
  0x48   : > { %3305 = vmatprep.mubr.msk.bf16.mxu0 %vm866_vm1, %v3457_v14 }
  0x49   : > { %3199 = vmatpush3.bf16.msra.mxu0 %v3488_v61 }
  0x4f   : > { %3306 = vmatmul.mubr.msk.bf16.gmra.mrb[16].mxu0 %vm866_vm1, %v3458_v15 }
  0x50   : > { %3309 = vmatprep.mubr.msk.bf16.mxu0 %vm866_vm1, %v3459_v16 }
  0x57   : > { %3310 = vmatmul.mubr.msk.bf16.gmra.mrb[20].mxu0 %vm866_vm1, %v3460_v17 }
  0x58   : > { %3313 = vmatprep.mubr.msk.bf16.mxu0 %vm866_vm1, %v3461_v18 }
  0x5f   : > { %3314 = vmatmul.mubr.msk.bf16.gmra.mrb[24].mxu0 %vm866_vm1, %v3462_v19 }
  0x60   : > { %3317 = vmatprep.mubr.msk.bf16.mxu0 %vm866_vm1, %v3463_v20 }
  0x67   : > { %3318 = vmatmul.mubr.msk.bf16.gmra.mrb[28].mxu0 %vm866_vm1, %v3464_v21 }
  0xb9   : > { %v2180_v22 = vpop.xlane.xlu0 %2179 }
  0xba   : > { %v2182_v23 = vmul.f32 0.03125, %v2180_v22 }
  0xbc   : > { %v3859_v24 = vsub.f32 %v2170_v9, %v2182_v23 }
  0xbe   : > { %v2184_v25 = vmul.f32 %v3859_v24, %v3859_v24 }
  0xc0   : > { %v2185_v29 = vsel %vm1112_vm2, %v2184_v25, 0.0 }
  0xc1   : > { %2186 = vadd.xlane.f32.xlu0 %v2185_v29 }
 0x102   : > { %v3291_v51 = vpop.f32.mrb[0].mxu0 }
 0x103   : > { %v953_v52 = vpop.f32.mrb[1].mxu0  ;;  %v962_v53 = vadd.f32 %v3291_v51, %v3924_v50 }
 0x104   : > { %v954_v54 = vadd.f32 %v3924_v50, %v953_v52  ;;  %v3292_v55 = vpop.f32.mrb[2].mxu0 }
 0x105   : > { %v956_v56 = vpop.f32.mrb[3].mxu0  ;;  %v965_v58 = vadd.f32 %v3292_v55, %v3924_v50  ;;  %v1082_v62 = vmax.f32 %v962_v53, 0.0 }
 0x106   : > { %v1080_v57 = vmax.f32 %v954_v54, 0.0  ;;  %v957_v59 = vadd.f32 %v3924_v50, %v956_v56 }
 0x107   : > { %v1083_v1 = vmax.f32 %v965_v58, 0.0  ;;  %v1116_v6 = vsel %vm1112_vm2, %v1082_v62, 0.0 }
 0x108   : > { %v1081_v63 = vmax.f32 %v957_v59, 0.0  ;;  %v1113_v0 = vsel %vm1112_vm2, %v1080_v57, 0.0 }
 0x109   : > { %v1118_v12 = vsel %vm1112_vm2, %v1083_v1, 0.0 }
 0x10a   : > { %v1114_v2 = vsel %vm1112_vm2, %v1081_v63, 0.0  ;;  %v3295_v3 = vpop.f32.mrb[4].mxu0 }
 0x10b   : > { %v1115_v4 = vadd.f32 %v1114_v2, %v1113_v0  ;;  %v969_v5 = vpop.f32.mrb[5].mxu0  ;;  %v978_v7 = vadd.f32 %v3295_v3, %v3924_v50 }
 0x10c   : > { %v970_v8 = vadd.f32 %v3924_v50, %v969_v5  ;;  %v3296_v9 = vpop.f32.mrb[6].mxu0 }
 0x10d   : > { %v1117_v10 = vadd.f32 %v1116_v6, %v1115_v4  ;;  %v972_v11 = vpop.f32.mrb[7].mxu0  ;;  %v981_v14 = vadd.f32 %v3296_v9, %v3924_v50  ;;  %v1086_v17 = vmax.f32 %v978_v7, 0.0 }
 0x10e   : > { %v1084_v13 = vmax.f32 %v970_v8, 0.0  ;;  %v973_v15 = vadd.f32 %v3924_v50, %v972_v11 }
 0x10f   : > { %v1119_v16 = vadd.f32 %v1118_v12, %v1117_v10  ;;  %v1087_v21 = vmax.f32 %v981_v14, 0.0  ;;  %v1124_v27 = vsel %vm1112_vm2, %v1086_v17, 0.0 }
 0x110   : > { %v1120_v18 = vsel %vm1112_vm2, %v1084_v13, 0.0  ;;  %v1085_v19 = vmax.f32 %v973_v15, 0.0 }
 0x111   : > { %v1121_v20 = vadd.f32 %v1120_v18, %v1119_v16  ;;  %v1126_v34 = vsel %vm1112_vm2, %v1087_v21, 0.0 }
 0x112   : > { %v1122_v22 = vsel %vm1112_vm2, %v1085_v19, 0.0  ;;  %v3299_v23 = vpop.f32.mrb[8].mxu0 }
 0x113   : > { %v1123_v25 = vadd.f32 %v1122_v22, %v1121_v20  ;;  %v985_v26 = vpop.f32.mrb[9].mxu0  ;;  %v994_v28 = vadd.f32 %v3299_v23, %v3924_v50 }
 0x114   : > { %v986_v29 = vadd.f32 %v3924_v50, %v985_v26  ;;  %v3300_v30 = vpop.f32.mrb[10].mxu0 }
 0x115   : > { %v1125_v31 = vadd.f32 %v1124_v27, %v1123_v25  ;;  %v988_v32 = vpop.f32.mrb[11].mxu0  ;;  %v997_v38 = vadd.f32 %v3300_v30, %v3924_v50  ;;  %v1090_v42 = vmax.f32 %v994_v28, 0.0 }
 0x116   : > { %v1088_v35 = vmax.f32 %v986_v29, 0.0  ;;  %v989_v40 = vadd.f32 %v3924_v50, %v988_v32 }
 0x117   : > { %v1127_v41 = vadd.f32 %v1126_v34, %v1125_v31  ;;  %v1091_v46 = vmax.f32 %v997_v38, 0.0  ;;  %v1132_v52 = vsel %vm1112_vm2, %v1090_v42, 0.0 }
 0x118   : > { %v1128_v43 = vsel %vm1112_vm2, %v1088_v35, 0.0  ;;  %v1089_v44 = vmax.f32 %v989_v40, 0.0 }
 0x119   : > { %v1129_v45 = vadd.f32 %v1128_v43, %v1127_v41  ;;  %v1134_v58 = vsel %vm1112_vm2, %v1091_v46, 0.0 }
 0x11a   : > { %v1130_v47 = vsel %vm1112_vm2, %v1089_v44, 0.0  ;;  %v3303_v48 = vpop.f32.mrb[12].mxu0 }
 0x11b   : > { %v1131_v49 = vadd.f32 %v1130_v47, %v1129_v45  ;;  %v1001_v51 = vpop.f32.mrb[13].mxu0  ;;  %v1010_v53 = vadd.f32 %v3303_v48, %v3924_v50 }
 0x11c   : > { %v1002_v54 = vadd.f32 %v3924_v50, %v1001_v51  ;;  %v3304_v55 = vpop.f32.mrb[14].mxu0 }
 0x11d   : > { %v1133_v56 = vadd.f32 %v1132_v52, %v1131_v49  ;;  %v1004_v57 = vpop.f32.mrb[15].mxu0  ;;  %v1013_v60 = vadd.f32 %v3304_v55, %v3924_v50  ;;  %v1094_v63 = vmax.f32 %v1010_v53, 0.0 }
 0x11e   : > { %v1092_v59 = vmax.f32 %v1002_v54, 0.0  ;;  %v1005_v61 = vadd.f32 %v3924_v50, %v1004_v57 }
 0x11f   : > { %v1135_v62 = vadd.f32 %v1134_v58, %v1133_v56  ;;  %v1095_v3 = vmax.f32 %v1013_v60, 0.0  ;;  %v1140_v8 = vsel %vm1112_vm2, %v1094_v63, 0.0 }
 0x120   : > { %v1136_v0 = vsel %vm1112_vm2, %v1092_v59, 0.0  ;;  %v1093_v1 = vmax.f32 %v1005_v61, 0.0 }
 0x121   : > { %v1137_v2 = vadd.f32 %v1136_v0, %v1135_v62  ;;  %v1142_v14 = vsel %vm1112_vm2, %v1095_v3, 0.0 }
 0x122   : > { %v1138_v4 = vsel %vm1112_vm2, %v1093_v1, 0.0  ;;  %v3307_v5 = vpop.f32.mrb[16].mxu0 }
 0x123   : > { %v1139_v6 = vadd.f32 %v1138_v4, %v1137_v2  ;;  %v1017_v7 = vpop.f32.mrb[17].mxu0  ;;  %v1026_v9 = vadd.f32 %v3307_v5, %v3924_v50 }
 0x124   : > { %v1018_v10 = vadd.f32 %v3924_v50, %v1017_v7  ;;  %v3308_v11 = vpop.f32.mrb[18].mxu0 }
 0x125   : > { %v1141_v12 = vadd.f32 %v1140_v8, %v1139_v6  ;;  %v1020_v13 = vpop.f32.mrb[19].mxu0  ;;  %v1029_v16 = vadd.f32 %v3308_v11, %v3924_v50  ;;  %v1098_v19 = vmax.f32 %v1026_v9, 0.0 }
 0x126   : > { %v1096_v15 = vmax.f32 %v1018_v10, 0.0  ;;  %v1021_v17 = vadd.f32 %v3924_v50, %v1020_v13 }
 0x127   : > { %v1143_v18 = vadd.f32 %v1142_v14, %v1141_v12  ;;  %v1099_v23 = vmax.f32 %v1029_v16, 0.0  ;;  %v1148_v29 = vsel %vm1112_vm2, %v1098_v19, 0.0 }
 0x128   : > { %v1144_v20 = vsel %vm1112_vm2, %v1096_v15, 0.0  ;;  %v1097_v21 = vmax.f32 %v1021_v17, 0.0 }
 0x129   : > { %v1145_v22 = vadd.f32 %v1144_v20, %v1143_v18  ;;  %v1150_v38 = vsel %vm1112_vm2, %v1099_v23, 0.0 }
 0x12a   : > { %v1146_v25 = vsel %vm1112_vm2, %v1097_v21, 0.0  ;;  %v3311_v26 = vpop.f32.mrb[20].mxu0 }
 0x12b   : > { %v1147_v27 = vadd.f32 %v1146_v25, %v1145_v22  ;;  %v1033_v28 = vpop.f32.mrb[21].mxu0  ;;  %v1042_v30 = vadd.f32 %v3311_v26, %v3924_v50 }
 0x12c   : > { %v1034_v31 = vadd.f32 %v3924_v50, %v1033_v28  ;;  %v3312_v32 = vpop.f32.mrb[22].mxu0 }
 0x12d   : > { %v1149_v34 = vadd.f32 %v1148_v29, %v1147_v27  ;;  %v1036_v35 = vpop.f32.mrb[23].mxu0  ;;  %v1045_v41 = vadd.f32 %v3312_v32, %v3924_v50  ;;  %v1102_v44 = vmax.f32 %v1042_v30, 0.0 }
 0x12e   : > { %v1100_v40 = vmax.f32 %v1034_v31, 0.0  ;;  %v1037_v42 = vadd.f32 %v3924_v50, %v1036_v35 }
 0x12f   : > { %v1151_v43 = vadd.f32 %v1150_v38, %v1149_v34  ;;  %v1103_v48 = vmax.f32 %v1045_v41, 0.0  ;;  %v1156_v54 = vsel %vm1112_vm2, %v1102_v44, 0.0 }
 0x130   : > { %v1152_v45 = vsel %vm1112_vm2, %v1100_v40, 0.0  ;;  %v1101_v46 = vmax.f32 %v1037_v42, 0.0  ;;  %v1194_v42 = vld [vmem:[%s4476_s29 + $0x48] sm:$0xff] }
 0x131   : > { %v1153_v47 = vadd.f32 %v1152_v45, %v1151_v43  ;;  %v1158_v60 = vsel %vm1112_vm2, %v1103_v48, 0.0  ;;  %v1198_v43 = vld [vmem:[%s4476_s29 + $0x68] sm:$0xff]  ;;  %v1191_v48 = vld [vmem:[%s4476_s29 + $0x30] sm:$0xff] }
 0x132   : > { %v1154_v49 = vsel %vm1112_vm2, %v1101_v46, 0.0  ;;  %v3315_v51 = vpop.f32.mrb[24].mxu0  ;;  %v3034_v46 = vcombine.high %v1194_v42, %v1198_v43 }
 0x133   : > { %v1155_v52 = vadd.f32 %v1154_v49, %v1153_v47  ;;  %v1049_v53 = vpop.f32.mrb[25].mxu0  ;;  %v1058_v55 = vadd.f32 %v3315_v51, %v3924_v50  ;;  %v1187_v47 = vld [vmem:[%s4476_s29 + $0x10] sm:$0xff]  ;;  %v3033_v49 = vcombine.low %v1194_v42, %v1198_v43  ;;  %v3498_v42 = vld [vmem:[%s4478_s1 + $0x148] sm:$0xff]  }
 0x134   : > { %v1050_v56 = vadd.f32 %v3924_v50, %v1049_v53  ;;  %v3316_v57 = vpop.f32.mrb[26].mxu0  ;;  %v3028_v51 = vcombine.high %v1187_v47, %v1191_v48  ;;  %v1199_v53 = vld [vmem:[%s4476_s29 + $0x70] sm:$0xff] }
 0x135   : > { %v1157_v58 = vadd.f32 %v1156_v54, %v1155_v52  ;;  %v1052_v59 = vpop.f32.mrb[27].mxu0  ;;  %v1061_v62 = vadd.f32 %v3316_v57, %v3924_v50  ;;  %v1106_v1 = vmax.f32 %v1058_v55, 0.0  ;;  %v1195_v52 = vld [vmem:[%s4476_s29 + $0x50] sm:$0xff]  ;;  %v3027_v54 = vcombine.low %v1187_v47, %v1191_v48  ;;  %v1196_v57 = vld [vmem:[%s4476_s29 + $0x58] sm:$0xff] }
 0x136   : > { %v1104_v61 = vmax.f32 %v1050_v56, 0.0  ;;  %v1053_v63 = vadd.f32 %v3924_v50, %v1052_v59  ;;  %v3036_v55 = vcombine.high %v1195_v52, %v1199_v53  ;;  %v3030_v56 = vcombine.high %v1188_v36, %v1192_v37  ;;  %v3501_v48 = vld [vmem:[%s4478_s1 + $0x150] sm:$0xff]  }
 0x137   : > { %v1159_v0 = vadd.f32 %v1158_v60, %v1157_v58  ;;  %v1107_v5 = vmax.f32 %v1061_v62, 0.0  ;;  %v1164_v10 = vsel %vm1112_vm2, %v1106_v1, 0.0  ;;  %v1200_v58 = vld [vmem:[%s4476_s29 + $0x78] sm:$0xff]  ;;  %v3029_v59 = vcombine.low %v1188_v36, %v1192_v37  ;;  %v3471_v62 = vld [vmem:[%s4478_s1 + $0x40] sm:$0xff]   ;;  %v3477_v1 = vld [vmem:[%s4478_s1 + $0x50] sm:$0xff]  }
 0x138   : > { %v1160_v2 = vsel %vm1112_vm2, %v1104_v61, 0.0  ;;  %v1105_v3 = vmax.f32 %v1053_v63, 0.0  ;;  %v3038_v60 = vcombine.high %v1196_v57, %v1200_v58  ;;  %v3037_v61 = vcombine.low %v1196_v57, %v1200_v58  ;;  %v3472_v63 = vld [vmem:[%s4478_s1] sm:$0xff]  }
 0x139   : > { %v1161_v4 = vadd.f32 %v1160_v2, %v1159_v0  ;;  %v1166_v16 = vsel %vm1112_vm2, %v1107_v5, 0.0  ;;  %v3473_v0 = vld [vmem:[%s4478_s1 + $0x48] sm:$0xff]   ;;  %v3478_v2 = vld [vmem:[%s4478_s1 + $0x10] sm:$0xff]   ;;  %v3483_v5 = vld [vmem:[%s4478_s1 + $0x60] sm:$0xff]  }
 0x13a   : > { %v1162_v6 = vsel %vm1112_vm2, %v1105_v3, 0.0  ;;  %v3319_v7 = vpop.f32.mrb[28].mxu0  ;;  %v3479_v3 = vld [vmem:[%s4478_s1 + $0x58] sm:$0xff]   ;;  %v3504_v36 = vld [vmem:[%s4478_s1 + $0x180] sm:$0xff]  }
 0x13b   : > { %v1163_v8 = vadd.f32 %v1162_v6, %v1161_v4  ;;  %v1065_v9 = vpop.f32.mrb[29].mxu0  ;;  %v1074_v11 = vadd.f32 %v3319_v7, %v3924_v50  ;;  %v3480_v4 = vld [vmem:[%s4478_s1 + $0x18] sm:$0xff]   ;;  %v3484_v6 = vld [vmem:[%s4478_s1 + $0x20] sm:$0xff]   ;;  %v3485_v7 = vld [vmem:[%s4478_s1 + $0x68] sm:$0xff]  }
 0x13c   : > { %v1066_v12 = vadd.f32 %v3924_v50, %v1065_v9  ;;  %v3320_v13 = vpop.f32.mrb[30].mxu0  ;;  %v3489_v9 = vld [vmem:[%s4478_s1 + $0x70] sm:$0xff]  }
 0x13d   : > { %v1165_v14 = vadd.f32 %v1164_v10, %v1163_v8  ;;  %v1068_v15 = vpop.f32.mrb[31].mxu0  ;;  %v1077_v18 = vadd.f32 %v3320_v13, %v3924_v50  ;;  %v1110_v21 = vmax.f32 %v1074_v11, 0.0  ;;  %v3486_v8 = vld [vmem:[%s4478_s1 + $0x28] sm:$0xff]   ;;  %v3490_v10 = vld [vmem:[%s4478_s1 + $0x30] sm:$0xff]   ;;  %v3491_v11 = vld [vmem:[%s4478_s1 + $0x78] sm:$0xff]  }
 0x13e   : > { %v1108_v17 = vmax.f32 %v1066_v12, 0.0  ;;  %v1069_v19 = vadd.f32 %v3924_v50, %v1068_v15  ;;  %v3492_v12 = vld [vmem:[%s4478_s1 + $0x38] sm:$0xff]   ;;  %v3493_v13 = vld [vmem:[%s4478_s1 + $0xf0] sm:$0xff]   ;;  %v3495_v15 = vld [vmem:[%s4478_s1 + $0x140] sm:$0xff]  }
 0x13f   : > { %v1167_v20 = vadd.f32 %v1166_v16, %v1165_v14  ;;  %v1111_v26 = vmax.f32 %v1077_v18, 0.0  ;;  %v1172_v29 = vsel %vm1112_vm2, %v1110_v21, 0.0  ;;  %v3494_v14 = vld [vmem:[%s4478_s1 + $0xb0] sm:$0xff]   ;;  %3200 = vmatprep.subr.bf16.mxu0 %v3493_v13  ;;  %v3497_v16 = vld [vmem:[%s4478_s1 + $0xf8] sm:$0xff]   ;;  %v3502_v18 = vld [vmem:[%s4478_s1 + $0x1c0] sm:$0xff]  }
 0x140   : > { %v1168_v22 = vsel %vm1112_vm2, %v1108_v17, 0.0  ;;  %v1109_v23 = vmax.f32 %v1069_v19, 0.0  ;;  %3201 = vmatpush3.bf16.msra.mxu0 %v3494_v14  ;;  %v3499_v17 = vld [vmem:[%s4478_s1 + $0xb8] sm:$0xff]   ;;  %v1283_v19 = vlaneseq  ;;  %v3515_v13 = vld [vmem:[%s4478_s1 + $0x128] sm:$0xff]  }
 0x141   : > { %v1169_v25 = vadd.f32 %v1168_v22, %v1167_v20  ;;  %v1174_v31 = vsel %vm1112_vm2, %v1111_v26, 0.0  ;;  %3202 = vmatprep.subr.bf16.mxu0 %v3497_v16  ;;  %v4109_v22 = vld [vmem:[%s4480_s6] sm:$0xff]  ;;  %v3516_v14 = vld [vmem:[%s4478_s1 + $0x198] sm:$0xff]   ;;  %s3143_s6 = sshll.u32 %s3777_s5, 7 }
 0x142   : > { %v1170_v27 = vsel %vm1112_vm2, %v1109_v23, 0.0  ;;  %v4103_v20 = vshrl.u32 %v1283_v19, 7 }
 0x143   : > { %v1171_v28 = vadd.f32 %v1170_v27, %v1169_v25 }
 0x144   : > { %3203 = vmatpush3.bf16.msra.mxu0 %v3499_v17  ;;  %v1285_v21 = vsub.s32 0, %v4103_v20  ;;  %v1289_v23 = vsub.s32 1, %v4103_v20  ;;  %v3517_v17 = vld [vmem:[%s4478_s1 + $0x170] sm:$0xff]  }
 0x145   : > { %v1173_v30 = vadd.f32 %v1172_v29, %v1171_v28  ;;  %3232 = vmatprep.subr.bf16.mxu0 %v3502_v18  ;;  %v3518_v18 = vld [vmem:[%s4478_s1 + $0x1e0] sm:$0xff]  }
 0x146   : > { %v1286_v25 = vrot.slane %v4109_v22, %v1285_v21  ;;  %v1290_v26 = vrot.slane %v4109_v22, %v1289_v23 }
 0x147   : > { %v1175_v32 = vadd.f32 %v1174_v31, %v1173_v30  ;;  %v1293_v30 = vsub.s32 2, %v4103_v20 }
 0x149   : > { %v1176_v34 = vrot.slane %v1175_v32, 4 }
 0x14b   : > { %v1177_v35 = vadd.f32 %v1176_v34, %v1175_v32  ;;  %v1297_v34 = vsub.s32 3, %v4103_v20 }
 0x14d   : > { %v1178_v38 = vrot.slane %v1177_v35, 2  ;;  %v1298_v43 = vrot.slane %v4109_v22, %v1297_v34  ;;  %v3523_v34 = vld [vmem:[%s4478_s1 + $0x138] sm:$0xff]  }
 0x14f   : > { %v1179_v50 = vadd.f32 %v1178_v38, %v1177_v35 }
 0x151   : > { %v1180_v40 = vrot.slane %v1179_v50, 1 }
 0x153   : > { %v1181_v41 = vadd.f32 %v1180_v40, %v1179_v50  ;;  %v3496_v50 = vld [vmem:[%s4478_s1 + $0x100] sm:$0xff]  }
 0x155   : > { %v1183_v44 = vmul.f32 0.00390625, %v1181_v41  ;;  %v1294_v41 = vrot.slane %v4109_v22, %v1293_v30 }
 0x157   : > { %v1184_v45 = vpack.c.bf16 %v1183_v44, %v1183_v44 }
 0x159   : > { %3039 = vmatmul.mubr.msk.bf16.vlgmr.msra.gmra.mrb[0].mxu1 %vm1112_vm2, %v1184_v45 }
 0x15a   : > { %1368 = vmatpush1.bf16.msra.mxu1 %v3025_v39  ;;  %1399 = vmatprep.mubr.bf16.mxu1 %v3626_v33  ;;  %v3035_v39 = vcombine.low %v1195_v52, %v1199_v53  ;;  %v1305_v52 = vsub.s32 5, %v4103_v20 }
 0x15b   : > { %1369 = vmatprep.subr.bf16.mxu1 %v3034_v46 }
 0x15c   : > { %v1306_v57 = vrot.slane %v4109_v22, %v1305_v52 }
 0x15e   : > { %1370 = vmatpush1.bf16.msra.mxu1 %v3033_v49 }
 0x15f   : > { %1408 = vmatprep.subr.bf16.mxu1 %v3028_v51 }
 0x161   : > { %3040 = vmatmul.mubr.msk.bf16.vlgmr.msra.gmra.mrb[4].mxu1 %vm1112_vm2, %v1184_v45 }
 0x162   : > { %1409 = vmatpush1.bf16.msra.mxu1 %v3027_v54  ;;  %1440 = vmatprep.mubr.bf16.mxu1 %v3626_v33 }
 0x163   : > { %1410 = vmatprep.subr.bf16.mxu1 %v3036_v55  ;;  %v3503_v55 = vld [vmem:[%s4478_s1 + $0x110] sm:$0xff]  }
 0x166   : > { %1411 = vmatpush1.bf16.msra.mxu1 %v3035_v39  ;;  %v3505_v39 = vld [vmem:[%s4478_s1 + $0x158] sm:$0xff]  }
 0x167   : > { %1449 = vmatprep.subr.bf16.mxu1 %v3030_v56  ;;  %v3506_v56 = vld [vmem:[%s4478_s1 + $0x1c8] sm:$0xff]  }
 0x169   : > { %3041 = vmatmul.mubr.msk.bf16.vlgmr.msra.gmra.mrb[8].mxu1 %vm1112_vm2, %v1184_v45 }
 0x16a   : > { %1450 = vmatpush1.bf16.msra.mxu1 %v3029_v59  ;;  %1481 = vmatprep.mubr.bf16.mxu1 %v3626_v33  ;;  %v3474_v33 = vld [vmem:[%s4478_s1 + $0x8] sm:$0xff]   ;;  %v3507_v59 = vld [vmem:[%s4478_s1 + $0x118] sm:$0xff]  }
 0x16b   : > { %1451 = vmatprep.subr.bf16.mxu1 %v3038_v60  ;;  %v3508_v60 = vld [vmem:[%s4478_s1 + $0x188] sm:$0xff]  }
 0x16e   : > { %1452 = vmatpush1.bf16.msra.mxu1 %v3037_v61  ;;  %v2187_v61 = vpop.xlane.xlu0 %2186 }
 0x16f   : > { %3166 = vmatprep.subr.bf16.mxu1 %v3471_v62 }
 0x171   : > { %3042 = vmatmul.mubr.msk.bf16.vlgmr.msra.gmra.mrb[12].mxu1 %vm1112_vm2, %v1184_v45  ;;  %v3500_v45 = vld [vmem:[%s4478_s1 + $0x108] sm:$0xff]  }
 0x172   : > { %3167 = vmatpush3.bf16.msra.mxu1 %v3472_v63  ;;  %v3509_v63 = vld [vmem:[%s4478_s1 + $0x160] sm:$0xff]  }
 0x173   : > { %3168 = vmatprep.subr.bf16.mxu1 %v3473_v0  ;;  %v3510_v0 = vld [vmem:[%s4478_s1 + $0x1d0] sm:$0xff]  }
 0x176   : > { %3169 = vmatpush3.bf16.msra.mxu1 %v3474_v33 }
 0x177   : > { %3170 = vmatprep.subr.bf16.mxu1 %v3477_v1 }
 0x17a   : > { %3171 = vmatpush3.bf16.msra.mxu1 %v3478_v2  ;;  %v1313_v2 = vsub.s32 7, %v4103_v20 }
 0x17b   : > { %3172 = vmatprep.subr.bf16.mxu1 %v3479_v3 }
 0x17e   : > { %3173 = vmatpush3.bf16.msra.mxu1 %v3480_v4  ;;  %v2188_v4 = vmul.f32 0.03125, %v2187_v61 }
 0x17f   : > { %3174 = vmatprep.subr.bf16.mxu1 %v3483_v5 }
 0x182   : > { %3175 = vmatpush3.bf16.msra.mxu1 %v3484_v6  ;;  %v3511_v6 = vld [vmem:[%s4478_s1 + $0x120] sm:$0xff]  }
 0x183   : > { %3176 = vmatprep.subr.bf16.mxu1 %v3485_v7  ;;  %v3512_v7 = vld [vmem:[%s4478_s1 + $0x190] sm:$0xff]  }
 0x186   : > { %3177 = vmatpush3.bf16.msra.mxu1 %v3486_v8  ;;  %v3513_v8 = vld [vmem:[%s4478_s1 + $0x168] sm:$0xff]  }
 0x187   : > { %3178 = vmatprep.subr.bf16.mxu1 %v3489_v9  ;;  %v3514_v9 = vld [vmem:[%s4478_s1 + $0x1d8] sm:$0xff]  }
 0x18a   : > { %3179 = vmatpush3.bf16.msra.mxu1 %v3490_v10  ;;  %v1314_v10 = vrot.slane %v4109_v22, %v1313_v2 }
 0x18b   : > { %3180 = vmatprep.subr.bf16.mxu1 %v3491_v11  ;;  %v2189_v11 = vadd.f32 1e-05, %v2188_v4 }
 0x18d   : > { %3545 = vrsqrt.f32 %v2189_v11 }
 0x18e   : > { %3181 = vmatpush3.bf16.msra.mxu1 %v3492_v12 }
 0x18f   : > { %3210 = vmatprep.subr.bf16.mxu1 %v3495_v15  ;;  %v1301_v15 = vsub.s32 4, %v4103_v20 }
 0x191   : > { %v1302_v30 = vrot.slane %v4109_v22, %v1301_v15 }
 0x22c   : > { %v1360_v27 = vpop.f32.mrb[0].mxu1 }
 0x22d   : > { %v1361_v28 = vadd.f32 %v1360_v27, %v1286_v25  ;;  %v1362_v29 = vpop.f32.mrb[1].mxu1 }
 0x22e   : > { %v1363_v31 = vadd.f32 %v1362_v29, %v1290_v26  ;;  %v1364_v32 = vpop.f32.mrb[2].mxu1  ;;  %v3520_v29 = vld [vmem:[%s4478_s1 + $0x1a0] sm:$0xff]  }
 0x22f   : > { %v1365_v35 = vpop.f32.mrb[3].mxu1  ;;  %v1490_v40 = vpack.c.bf16 %v1361_v28, %v1361_v28  ;;  %v3519_v28 = vld [vmem:[%s4478_s1 + $0x130] sm:$0xff]   ;;  %v3522_v32 = vld [vmem:[%s4478_s1 + $0x1e8] sm:$0xff]  }
 0x230   : > { %v1491_v38 = vpack.c.bf16 %v1363_v31, %v1363_v31  ;;  %v3521_v31 = vld [vmem:[%s4478_s1 + $0x178] sm:$0xff]   ;;  %v3524_v35 = vld [vmem:[%s4478_s1 + $0x1a8] sm:$0xff]  }
 0x232   : > { %2042 = vmatprep.mubr.bf16.mxu1 %v1491_v38 }
 0x233   : > { %2043 = vmatmul.mubr.bf16.vlgmr.msra.gmra.mrb[16].mxu1 %v1490_v40  ;;  %v3525_v40 = vld [vmem:[%s4478_s1 + $0x1f0] sm:$0xff]  }
 0x234   : > { %3211 = vmatpush3.bf16.msra.mxu1 %v3496_v50  ;;  %v1401_v44 = vpop.f32.mrb[4].mxu1  ;;  %v1309_v50 = vsub.s32 6, %v4103_v20 }
 0x235   : > { %v1402_v46 = vadd.f32 %v1401_v44, %v1294_v41  ;;  %v1403_v47 = vpop.f32.mrb[5].mxu1  ;;  %3212 = vmatprep.subr.bf16.mxu1 %v3498_v42  ;;  %v3526_v41 = vld [vmem:[%s4478_s1 + $0x1b0] sm:$0xff]   ;;  %v3527_v44 = vld [vmem:[%s4478_s1 + $0x1f8] sm:$0xff]  }
 0x236   : > { %v1404_v49 = vadd.f32 %v1403_v47, %v1298_v43  ;;  %v1405_v51 = vpop.f32.mrb[6].mxu1  ;;  %v1310_v43 = vrot.slane %v4109_v22, %v1309_v50  ;;  %v3528_v47 = vld [vmem:[%s4478_s1 + $0x1b8] sm:$0xff]  }
 0x237   : > { %v1406_v53 = vpop.f32.mrb[7].mxu1  ;;  %v1492_v37 = vpack.c.bf16 %v1402_v46, %v1402_v46  ;;  %v3546_v46 = vpop.eup %3545  ;;  %v3529_v51 = vld [vmem:[%s4426_s9] sm:$0xff]  }
 0x238   : > { %v1493_v54 = vpack.c.bf16 %v1404_v49, %v1404_v49  ;;  %3213 = vmatpush3.bf16.msra.mxu1 %v3500_v45  ;;  %v3627_v45 = vmov 0.0   ;;  %v2191_v22 = vmul.f32 %v3546_v46, %v3859_v24  ;;  %v3107_v49 = vld [vmem:[%s4481_s25] ss:$0 sm:$0xff]  ;;  %v3530_v24 = vld [vmem:[%s4426_s9 + $0x8] sm:$0xff]   ;;  %s3631_s25 = smov 80  }
 0x239   : > { %3214 = vmatprep.subr.bf16.mxu1 %v3501_v48 }
 0x23a   : > { %2082 = vmatprep.mubr.bf16.mxu0 %v1493_v54  ;;  %v2198_v53 = vmul.f32 %v3107_v49, %v2191_v22  ;;  %v3108_v54 = vld [vmem:[%s4425_s8] ss:$0 sm:$0xff] }
 0x23b   : > { %2083 = vmatmul.mubr.bf16.vlgmr.msra.gmra.mrb[32].mxu0 %v1492_v37 }
 0x23c   : > { %3215 = vmatpush3.bf16.msra.mxu1 %v3503_v55  ;;  %3233 = vmatpush3.bf16.msra.mxu0 %v3504_v36  ;;  %v1442_v58 = vpop.f32.mrb[8].mxu1  ;;  %v2205_v55 = vadd.f32 %v3108_v54, %v2198_v53 }
 0x23d   : > { %v1444_v62 = vpop.f32.mrb[9].mxu1  ;;  %3216 = vmatprep.subr.bf16.mxu1 %v3505_v39  ;;  %3234 = vmatprep.subr.bf16.mxu0 %v3506_v56  ;;  %v1443_v38 = vadd.f32 %v1442_v58, %v1302_v30 }
 0x23e   : > { %v1445_v33 = vadd.f32 %v1444_v62, %v1306_v57  ;;  %v1446_v1 = vpop.f32.mrb[10].mxu1  ;;  %v2206_v36 = vpack.c.bf16 %v2205_v55, %v2205_v55 }
 0x23f   : > { %v1447_v3 = vpop.f32.mrb[11].mxu1  ;;  %v1494_v42 = vpack.c.bf16 %v1443_v38, %v1443_v38 }
 0x240   : > { %v1495_v5 = vpack.c.bf16 %v1445_v33, %v1445_v33  ;;  %3217 = vmatpush3.bf16.msra.mxu1 %v3507_v59  ;;  %3235 = vmatpush3.bf16.msra.mxu0 %v3508_v60 }
 0x241   : > { %3218 = vmatprep.subr.bf16.mxu1 %v3509_v63  ;;  %3236 = vmatprep.subr.bf16.mxu0 %v3510_v0 }
 0x242   : > { %2122 = vmatprep.mubr.bf16.mxu1 %v1495_v5 }
 0x244   : > { %3219 = vmatpush3.bf16.msra.mxu1 %v3511_v6  ;;  %3237 = vmatpush3.bf16.msra.mxu0 %v3512_v7  ;;  %v1483_v12 = vpop.f32.mrb[12].mxu1 }
 0x245   : > { %v1485_v16 = vpop.f32.mrb[13].mxu1  ;;  %3220 = vmatprep.subr.bf16.mxu1 %v3513_v8  ;;  %3238 = vmatprep.subr.bf16.mxu0 %v3514_v9  ;;  %v1484_v48 = vadd.f32 %v1483_v12, %v1310_v43  ;;  %v3109_v12 = vld [vmem:[%s4427_s10] ss:$0 sm:$0xff] }
 0x246   : > { %v1486_v23 = vadd.f32 %v1485_v16, %v1314_v10  ;;  %v1487_v25 = vpop.f32.mrb[14].mxu1 }
 0x247   : > { %v1488_v26 = vpop.f32.mrb[15].mxu1  ;;  %v1496_v52 = vpack.c.bf16 %v1484_v48, %v1484_v48 }
 0x248   : > { %v1497_v27 = vpack.c.bf16 %v1486_v23, %v1486_v23  ;;  %3221 = vmatpush3.bf16.msra.mxu1 %v3515_v13  ;;  %3239 = vmatpush3.bf16.msra.mxu0 %v3516_v14 }
 0x249   : > { %3222 = vmatprep.subr.bf16.mxu1 %v3517_v17  ;;  %3240 = vmatprep.subr.bf16.mxu0 %v3518_v18 }
 0x24a   : > { %2162 = vmatprep.mubr.bf16.mxu0 %v1497_v27 }
 0x24c   : > { %3223 = vmatpush3.bf16.msra.mxu1 %v3519_v28  ;;  %3241 = vmatpush3.bf16.msra.mxu0 %v3520_v29 }
 0x24d   : > { %3224 = vmatprep.subr.bf16.mxu1 %v3521_v31  ;;  %3242 = vmatprep.subr.bf16.mxu0 %v3522_v32  ;;  %v2174_v31 = vand.u32 127, %v1283_v19 }
 0x24f   : > { %vm2175_vm5 = vcmp.le.s32.totalorder %v2174_v31, %v4103_v20 }
 0x250   : > { %3225 = vmatpush3.bf16.msra.mxu1 %v3523_v34  ;;  %3243 = vmatpush3.bf16.msra.mxu0 %v3524_v35 }
 0x251   : > { %3244 = vmatprep.subr.bf16.mxu0 %v3525_v40  ;;  %3329 = vmatprep.subr.bf16.mxu1 %v3627_v45 }
 0x253   : > { %2123 = vmatmul.mubr.bf16.vlgmr.msra.gmra.mrb[20].mxu1 %v1494_v42 }
 0x254   : > { %3245 = vmatpush3.bf16.msra.mxu0 %v3526_v41  ;;  %3331 = vmatprep.mubr.msk.bf16.mxu1 %vm3628_vm3, %v3627_v45 }
 0x255   : > { %3246 = vmatprep.subr.bf16.mxu0 %v3527_v44 }
 0x258   : > { %3247 = vmatpush3.bf16.msra.mxu0 %v3528_v47 }
 0x259   : > { %3321 = vmatprep.subr.bf16.mxu0 %v3627_v45 }
 0x25b   : > { %2163 = vmatmul.mubr.bf16.vlgmr.msra.gmra.mrb[36].mxu0 %v1496_v52 }
 0x25c   : > { %3322 = vmatpush3.bf16.msra.mxu0 %v3529_v51  ;;  %3325 = vmatprep.mubr.msk.bf16.mxu0 %vm3628_vm3, %v3627_v45 }
 0x25d   : > { %3323 = vmatprep.subr.bf16.mxu0 %v3627_v45 }
 0x260   : > { %3324 = vmatpush3.bf16.msra.mxu0 %v3530_v24 }
 0x261   : > { %3335 = vmatprep.subr.bf16.mxu0 %v3627_v45 }
 0x263   : > { %3326 = vmatmul.mubr.msk.bf16.vlgmr.msra.gmra.mrb[40].mxu0 %vm1112_vm2, %v2206_v36 }
 0x264   : > { %3337 = vmatprep.mubr.msk.bf16.mxu0 %vm3628_vm3, %v3627_v45 }
 0x306   : > { %v3182_v37 = vpop.f32.mrb[16].mxu1 }
 0x307   : > { %v3183_v39 = vpop.f32.mrb[17].mxu1 }
 0x308   : > { %v3184_v56 = vadd.f32 %v3183_v39, %v3182_v37  ;;  %v3185_v57 = vpop.f32.mrb[18].mxu1 }
 0x309   : > { %v3186_v58 = vpop.f32.mrb[19].mxu1 }
 0x30e   : > { %v3204_v59 = vpop.f32.mrb[32].mxu0 }
 0x30f   : > { %v3205_v60 = vpop.f32.mrb[33].mxu0 }
 0x310   : > { %v3206_v61 = vadd.f32 %v3205_v60, %v3204_v59  ;;  %v3207_v62 = vpop.f32.mrb[34].mxu0 }
 0x311   : > { %v3208_v63 = vpop.f32.mrb[35].mxu0 }
 0x312   : > { %v2085_v0 = vadd.f32 %v3206_v61, %v3184_v56 }
 0x326   : > { %v3226_v33 = vpop.f32.mrb[20].mxu1 }
 0x327   : > { %v3227_v1 = vpop.f32.mrb[21].mxu1 }
 0x328   : > { %v3228_v2 = vadd.f32 %v3227_v1, %v3226_v33  ;;  %v3229_v3 = vpop.f32.mrb[22].mxu1  ;;  %v3531_v33 = vld [vmem:[%s4428_s11] sm:$0xff]   ;;  %v3532_v1 = vld [vmem:[%s4428_s11 + $0x8] sm:$0xff]  }
 0x329   : > { %v3230_v4 = vpop.f32.mrb[23].mxu1 }
 0x32a   : > { %v2125_v5 = vadd.f32 %v3228_v2, %v2085_v0 }
 0x32e   : > { %v3248_v6 = vpop.f32.mrb[36].mxu0 }
 0x32f   : > { %v3249_v7 = vpop.f32.mrb[37].mxu0 }
 0x330   : > { %v3250_v8 = vadd.f32 %v3249_v7, %v3248_v6  ;;  %v3251_v9 = vpop.f32.mrb[38].mxu0 }
 0x331   : > { %v3252_v10 = vpop.f32.mrb[39].mxu0 }
 0x332   : > { %v4242_v11 = vadd.f32 %v3250_v8, %v2125_v5 }
 0x336   : > { %v2267_v13 = vpop.f32.mrb[40].mxu0 }
 0x337   : > { %v2268_v14 = vadd.f32 %v3109_v12, %v2267_v13  ;;  %v3327_v15 = vpop.f32.mrb[41].mxu0 }
 0x338   : > { %v2270_v16 = vpop.f32.mrb[42].mxu0 }
 0x339   : > { %v2273_v17 = vmul.f32 0.25, %v2268_v14  ;;  %v2275_v18 = vpack.c.bf16 %v2268_v14, %v2268_v14  ;;  %v3328_v23 = vpop.f32.mrb[43].mxu0  ;;  %v3117_v14 = vld [vmem:[%s4429_s12] ss:$0 sm:$0xff] }
 0x33a   : > { %v3561_v23 = vld [vmem:[%s3831_s2] sm:$0xff] }
 0x33b   : > { %v2274_v25 = vpack.c.bf16 %v2273_v17, %v2273_v17  ;;  %2277 = vrot.lane.b32.xlu1 %v2275_v18, %s3629_s28  ;;  %s4375_s28 = scalar_lea.hbm %s4483_s27, %s3143_s6 }
 0x33d   : > { %2390 = vrot.lane.b32.xlu0 %v2274_v25, %s3630_s0  ;;  %s714_s0 = sand.u32 1, %s3616_s30  }
 0x33e   : > { %s2895_s2 = scalar_lea.sflag [#allocation3], %s714_s0 }
 0x33f   : > { %2392 = vrot.lane.b32.xlu1 %v2275_v18, %s3631_s25  ;;  %s2983_s25 = sshll.u32 %s714_s0, 3 }
 0x340   : > { %s716_s3 = scalar_lea.vmem [#allocation2], %s2983_s25  ;;  %s3635_s25 = smov [#allocation2]  }
 0x341   : > { %s2908_s23 = sshll.u32 %s716_s3, 4  ;;  %s4377_s23 = int_to_ptr.vmem [resolvable:$true] %s2908_s23 }
 0x342   : > { %s3562_s5 = scalar_lea.vmem %s4377_s23, 128 }
 0x343   : > { %p3563_p11 = scmp.ne.s32.totalorder %s4377_s23, %s3562_s5 }
 0x345   : > { %p3564_p12 = pnand %p3563_p11, %p3794_p5 }
 0x347   : > { %p3565_p13 = pneg %p3564_p12 }
 0x3ad   : > { %v2278_v26 = vpop.permute.xlu1 %2277 }
 0x3ae   : > { %v2284_v27 = vsel %vm2279_vm4, %v2278_v26, 0 }
 0x3af   : > { %3330 = vmatpush3.bf16.xpose.msra.mxu1 %v2284_v27  ;;  %v2391_v30 = vpop.permute.xlu0 %2390 }
 0x3b0   : > { %3341 = vmatprep.subr.bf16.mxu1 %v3627_v45 }
 0x3b1   : > { %v2393_v28 = vpop.permute.xlu1 %2392 }
 0x3b2   : > { %v2398_v29 = vsel %vm2279_vm4, %v2393_v28, 0 }
 0x3b6   : > { %3332 = vmatmul.mubr.msk.bf16.vlgmr.msra.gmra.mrb[24].mxu1 %vm2279_vm4, %v2274_v25 }
 0x3b7   : > { %3342 = vmatpush3.bf16.xpose.msra.mxu1 %v2398_v29  ;;  %3343 = vmatprep.mubr.msk.bf16.mxu1 %vm3628_vm3, %v3627_v45 }
 0x3b8   : > { %3353 = vmatprep.subr.bf16.mxu1 %v3627_v45 }
 0x3be   : > { %3344 = vmatmul.mubr.msk.bf16.vlgmr.msra.gmra.mrb[28].mxu1 %vm2279_vm4, %v2391_v30 }
 0x3bf   : > { %3357 = vmatprep.mubr.msk.bf16.mxu1 %vm3628_vm3, %v3627_v45  ;;  %3354 = vmatpush3.bf16.msra.mxu1 %v3531_v33 }
 0x3c0   : > { %3355 = vmatprep.subr.bf16.mxu1 %v3627_v45 }
 0x3c3   : > { %3356 = vmatpush3.bf16.msra.mxu1 %v3532_v1 }
 0x3c4   : > { %3369 = vmatprep.subr.bf16.mxu1 %v3627_v45 }
 0x489   : > { %v2320_v32 = vpop.f32.mrb[24].mxu1 }
 0x48a   : > { %v2326_v34 = vsel %vm2175_vm5, %v2320_v32, -1e+30  ;;  %v3333_v35 = vpop.f32.mrb[25].mxu1 }
 0x48b   : > { %v2323_v38 = vpop.f32.mrb[26].mxu1  ;;  %v2328_v50 = vsel %vm2327_vm6, %v2326_v34, -inf  ;;  %v3534_v35 = vld [vmem:[%s4432_s15 + $0x8] sm:$0xff]  }
 0x48c   : > { %2329 = vmax.xlane.f32.xlu1 %v2328_v50  ;;  %v3334_v40 = vpop.f32.mrb[27].mxu1 }
 0x491   : > { %v2434_v41 = vpop.f32.mrb[28].mxu1 }
 0x492   : > { %v2440_v42 = vsel %vm2175_vm5, %v2434_v41, -1e+30  ;;  %v3345_v43 = vpop.f32.mrb[29].mxu1 }
 0x493   : > { %v2437_v44 = vpop.f32.mrb[30].mxu1  ;;  %v2441_v46 = vsel %vm2327_vm6, %v2440_v42, -inf }
 0x494   : > { %2442 = vmax.xlane.f32.xlu0 %v2441_v46  ;;  %v3346_v47 = vpop.f32.mrb[31].mxu1  ;;  %v3122_v44 = vld [vmem:[%s4431_s14] ss:$0 sm:$0xff] }
 0x4aa   : > { %2453 = vrot.lane.b32.xlu0 %v2275_v18, %s3632_s4  ;;  %s3566_s4 = sshll.u32 %s3635_s25, 4  ;;  %s3567_s4 = int_to_ptr.vmem [resolvable:$false] %s3566_s4 }
 0x4ab   : > { %s3568_s1 = scalar_lea.vmem %s3567_s4, 256  ;;  %p3569_p0 = scmp.lt.s32.totalorder %s4377_s23, %s3567_s4 }
 0x4ac   : > { %p3570_p1 = scmp.lt.s32.totalorder %s3568_s1, %s3562_s5 }
 0x4ae   : > { %p3571_p2 = por %p3570_p1, %p3569_p0 }
 0x4b0   : > { %p3572_p3 = pnand %p3571_p2, %p3565_p13 }
 0x519   : > { %v2330_v19 = vpop.xlane.xlu1 %2329 }
 0x51a   : > { %v2331_v22 = vsub.f32 %v2326_v34, %v2330_v19  ;;  %v3533_v34 = vld [vmem:[%s4432_s15] sm:$0xff]  }
 0x51c   : > { %v2332_v48 = vmul.f32 1.442695, %v2331_v22  ;;  %v3535_v22 = vld [vmem:[%s4434_s17] sm:$0xff]  }
 0x51e   : > { %3547 = vpow2.f32 %v2332_v48  ;;  %v3536_v48 = vld [vmem:[%s4434_s17 + $0x8] sm:$0xff]  }
 0x521   : > { %v2443_v49 = vpop.xlane.xlu0 %2442 }
 0x522   : > { %v2444_v51 = vsub.f32 %v2440_v42, %v2443_v49  ;;  %v3121_v42 = vld [vmem:[%s4430_s13] ss:$0 sm:$0xff]  ;;  %v3537_v49 = vld [vmem:[%s4434_s17 + $0x10] sm:$0xff]  }
 0x524   : > { %v2445_v52 = vmul.f32 1.442695, %v2444_v51  ;;  %v3538_v51 = vld [vmem:[%s4434_s17 + $0x18] sm:$0xff]  }
 0x525   : > { %v2454_v59 = vpop.permute.xlu0 %2453 }
 0x526   : > { %3549 = vpow2.f32 %v2445_v52  ;;  %v2459_v61 = vsel %vm2345_vm7, %v2454_v59, 0  ;;  %v3539_v52 = vld [vmem:[%s4434_s17 + $0x20] sm:$0xff]  }
 0x528   : > { %v3548_v53 = vpop.eup %3547 }
 0x529   : > { %v2334_v54 = vsel %vm2327_vm6, %v3548_v53, 0.0 }
 0x52a   : > { %2335 = vadd.xlane.f32.xlu1 %v2334_v54  ;;  %v3541_v54 = vld [vmem:[%s4434_s17 + $0x30] sm:$0xff]  }
 0x530   : > { %v3550_v24 = vpop.eup %3549 }
 0x531   : > { %v2447_v55 = vsel %vm2327_vm6, %v3550_v24, 0.0 }
 0x532   : > { %2448 = vadd.xlane.f32.xlu1 %v2447_v55  ;;  %v3123_v55 = vld [vmem:[%s4433_s16] ss:$0 sm:$0xff] }
 0x543   : > { %2340 = vrot.lane.b32.xlu1 %v2275_v18, %s3633_s24 }
 0x5b7   : > { %v2336_v36 = vpop.xlane.xlu1 %2335 }
 0x5b8   : > { %3551 = vrcp.f32 %v2336_v36 }
 0x5bf   : > { %v2449_v37 = vpop.xlane.xlu1 %2448 }
 0x5c0   : > { %3553 = vrcp.f32 %v2449_v37 }
 0x5c2   : > { %v3552_v39 = vpop.eup %3551 }
 0x5c3   : > { %v2338_v56 = vmul.f32 %v3552_v39, %v3548_v53  ;;  %v2341_v57 = vpop.permute.xlu1 %2340  ;;  %v3540_v53 = vld [vmem:[%s4434_s17 + $0x28] sm:$0xff]  }
 0x5c4   : > { %v2347_v58 = vsel %vm2345_vm7, %v2341_v57, 0 }
 0x5c5   : > { %3336 = vmatpush3.bf16.msra.mxu0 %v2347_v58  ;;  %v2339_v60 = vpack.c.bf16 %v2338_v56, %v2338_v56 }
 0x5c6   : > { %3347 = vmatprep.subr.bf16.mxu0 %v3627_v45 }
 0x5c8   : > { %3338 = vmatmul.mubr.msk.bf16.vlgmr.msra.gmra.mrb[44].mxu0 %vm2327_vm6, %v2339_v60 }
 0x5c9   : > { %3348 = vmatpush3.bf16.msra.mxu0 %v2459_v61  ;;  %3349 = vmatprep.mubr.msk.bf16.mxu0 %vm3628_vm3, %v3627_v45 }
 0x5ca   : > { %v3554_v62 = vpop.eup %3553  ;;  %3361 = vmatprep.subr.bf16.mxu0 %v3627_v45 }
 0x5cb   : > { %v2451_v63 = vmul.f32 %v3554_v62, %v3550_v24  ;;  %v3542_v24 = vld [vmem:[%s4434_s17 + $0x38] sm:$0xff]  }
 0x5cd   : > { %v2452_v0 = vpack.c.bf16 %v2451_v63, %v2451_v63 }
 0x5d0   : > { %3350 = vmatmul.mubr.msk.bf16.vlgmr.msra.gmra.mrb[48].mxu0 %vm2327_vm6, %v2452_v0 }
 0x5d1   : > { %3365 = vmatprep.mubr.msk.bf16.mxu0 %vm3628_vm3, %v3627_v45  ;;  %3362 = vmatpush3.bf16.msra.mxu0 %v3533_v34  ;;  %v2829_v34 = vrot.slane %v4242_v11, %v1285_v21 }
 0x5d2   : > { %3363 = vmatprep.subr.bf16.mxu0 %v3627_v45 }
 0x5d5   : > { %3364 = vmatpush3.bf16.msra.mxu0 %v3534_v35 }
 0x5d6   : > { %3389 = vmatprep.subr.bf16.mxu0 %v3627_v45 }
 0x69b   : > { %v2383_v2 = vpop.f32.mrb[44].mxu0 }
 0x69c   : > { %v3339_v3 = vpop.f32.mrb[45].mxu0 }
 0x69d   : > { %v2386_v4 = vpop.f32.mrb[46].mxu0  ;;  %v3127_v3 = vld [vmem:[%s4435_s18] ss:$0 sm:$0xff] }
 0x69e   : > { %v3340_v5 = vpop.f32.mrb[47].mxu0 }
 0x6a3   : > { %v2495_v6 = vpop.f32.mrb[48].mxu0 }
 0x6a4   : > { %2502 = vrot.lane.b32.xlu1 %v2495_v6, %s3634_s26  ;;  %v3351_v7 = vpop.f32.mrb[49].mxu0 }
 0x6a5   : > { %v2498_v8 = vpop.f32.mrb[50].mxu0 }
 0x6a6   : > { %v3352_v9 = vpop.f32.mrb[51].mxu0 }
 0x716   : > { %v2503_v10 = vpop.permute.xlu1 %2502 }
 0x717   : > { %v2505_v12 = vsel %vm2279_vm4, %v2383_v2, %v2503_v10 }
 0x718   : > { %v2506_v13 = vpack.c.bf16 %v2505_v12, %v2505_v12 }
 0x71a   : > { %3358 = vmatmul.mubr.msk.bf16.vlgmr.msra.gmra.mrb[32].mxu1 %vm1112_vm2, %v2506_v13 }
 0x71b   : > { %3385 = vmatprep.mubr.msk.bf16.mxu1 %vm3628_vm3, %v3627_v45  ;;  %3370 = vmatpush3.bf16.msra.mxu1 %v3535_v22 }
 0x71c   : > { %3371 = vmatprep.subr.bf16.mxu1 %v3627_v45 }
 0x71f   : > { %3372 = vmatpush3.bf16.msra.mxu1 %v3536_v48 }
 0x720   : > { %3373 = vmatprep.subr.bf16.mxu1 %v3627_v45 }
 0x723   : > { %3374 = vmatpush3.bf16.msra.mxu1 %v3537_v49 }
 0x724   : > { %3375 = vmatprep.subr.bf16.mxu1 %v3627_v45 }
 0x727   : > { %3376 = vmatpush3.bf16.msra.mxu1 %v3538_v51 }
 0x728   : > { %3377 = vmatprep.subr.bf16.mxu1 %v3627_v45 }
 0x72b   : > { %3378 = vmatpush3.bf16.msra.mxu1 %v3539_v52 }
 0x72c   : > { %3379 = vmatprep.subr.bf16.mxu1 %v3627_v45 }
 0x72f   : > { %3380 = vmatpush3.bf16.msra.mxu1 %v3540_v53 }
 0x730   : > { %3381 = vmatprep.subr.bf16.mxu1 %v3627_v45 }
 0x733   : > { %3382 = vmatpush3.bf16.msra.mxu1 %v3541_v54 }
 0x734   : > { %3383 = vmatprep.subr.bf16.mxu1 %v3627_v45 }
 0x737   : > { %3384 = vmatpush3.bf16.msra.mxu1 %v3542_v24 }
 0x7ed   : > { %v2567_v15 = vpop.f32.mrb[32].mxu1 }
 0x7ee   : > { %v2568_v16 = vadd.f32 %v3117_v14, %v2567_v15  ;;  %v3359_v17 = vpop.f32.mrb[33].mxu1 }
 0x7ef   : > { %v2570_v18 = vpop.f32.mrb[34].mxu1  ;;  %v3543_v17 = vld [vmem:[%s4438_s21] sm:$0xff]  }
 0x7f0   : > { %v4287_v25 = vadd.f32 %v3561_v23, %v2568_v16  ;;  %v3360_v26 = vpop.f32.mrb[35].mxu1  ;;  %v3544_v18 = vld [vmem:[%s4438_s21 + $0x8] sm:$0xff]  }
 0x7f2   : > { %v2576_v27 = vsel %vm1112_vm2, %v4287_v25, 0.0 }
 0x7f3   : > { %2577 = vadd.xlane.f32.xlu1 %v2576_v27 }
 0x880   : > { %v2578_v28 = vpop.xlane.xlu1 %2577 }
 0x881   : > { %v2579_v29 = vmul.f32 0.03125, %v2578_v28  ;;  %v3136_v28 = vld [vmem:[%s4436_s19] ss:$0 sm:$0xff] }
 0x883   : > { %v2580_v30 = vsub.f32 %v4287_v25, %v2579_v29 }
 0x885   : > { %v2581_v31 = vmul.f32 %v2580_v30, %v2580_v30 }
 0x887   : > { %v2582_v32 = vsel %vm1112_vm2, %v2581_v31, 0.0 }
 0x888   : > { %2583 = vadd.xlane.f32.xlu0 %v2582_v32 }
 0x915   : > { %v2584_v38 = vpop.xlane.xlu0 %2583 }
 0x916   : > { %v2585_v50 = vmul.f32 0.03125, %v2584_v38  ;;  %v3141_v38 = vld [vmem:[%s4439_s22] ss:$0 sm:$0xff] }
 0x918   : > { %v2586_v40 = vadd.f32 1e-05, %v2585_v50 }
 0x91a   : > { %3555 = vrsqrt.f32 %v2586_v40 }
 0x924   : > { %v3556_v41 = vpop.eup %3555 }
 0x925   : > { %v2588_v43 = vmul.f32 %v3556_v41, %v2580_v30 }
 0x927   : > { %v2595_v46 = vmul.f32 %v3121_v42, %v2588_v43 }
 0x929   : > { %v2602_v47 = vadd.f32 %v3122_v44, %v2595_v46 }
 0x92b   : > { %v2603_v19 = vpack.c.bf16 %v2602_v47, %v2602_v47 }
 0x92d   : > { %3366 = vmatmul.mubr.msk.bf16.vlgmr.msra.gmra.mrb[52].mxu0 %vm1112_vm2, %v2603_v19 }
 0x92e   : > { %3393 = vmatprep.mubr.msk.bf16.mxu0 %vm3628_vm3, %v3627_v45  ;;  %3390 = vmatpush3.bf16.msra.mxu0 %v3543_v17 }
 0x92f   : > { %3391 = vmatprep.subr.bf16.mxu0 %v3627_v45  ;;  %v3137_v45 = vld [vmem:[%s4437_s20] ss:$0 sm:$0xff] }
 0x932   : > { %3392 = vmatpush3.bf16.msra.mxu0 %v3544_v18 }
 0xa00   : > { %v2664_v36 = vpop.f32.mrb[52].mxu0 }
 0xa01   : > { %v2665_v37 = vadd.f32 %v3123_v55, %v2664_v36  ;;  %v3367_v39 = vpop.f32.mrb[53].mxu0 }
 0xa02   : > { %v2667_v56 = vpop.f32.mrb[54].mxu0 }
 0xa03   : > { %v2670_v57 = vmul.f32 %v2665_v37, %v2665_v37  ;;  %v3368_v58 = vpop.f32.mrb[55].mxu0 }
 0xa05   : > { %v2671_v59 = vmul.f32 %v2670_v57, %v2665_v37 }
 0xa07   : > { %v2672_v60 = vmul.f32 0.044715, %v2671_v59 }
 0xa09   : > { %v2673_v61 = vadd.f32 %v2672_v60, %v2665_v37 }
 0xa0b   : > { %v2674_v62 = vmul.f32 0.7978846, %v2673_v61 }
 0xa0d   : > { %3557 = vtanh.f32 %v2674_v62 }
 0xa17   : > { %v3558_v63 = vpop.eup %3557 }
 0xa18   : > { %v2676_v0 = vadd.f32 1.0, %v3558_v63 }
 0xa1a   : > { %v2677_v33 = vmul.f32 0.5, %v2676_v0 }
 0xa1c   : > { %v2678_v1 = vmul.f32 %v2677_v33, %v2665_v37 }
 0xa1e   : > { %v2679_v2 = vpack.c.bf16 %v2678_v1, %v2678_v1 }
 0xa20   : > { %3386 = vmatmul.mubr.bf16.vlgmr.msra.gmra.mrb[36].mxu1 %v2679_v2 }
 0xaf3   : > { %v2785_v4 = vpop.f32.mrb[36].mxu1 }
 0xaf4   : > { %v2786_v5 = vadd.f32 %v3127_v3, %v2785_v4  ;;  %v3387_v6 = vpop.f32.mrb[37].mxu1 }
 0xaf5   : > { %v2788_v7 = vpop.f32.mrb[38].mxu1 }
 0xaf6   : > { %v3388_v8 = vpop.f32.mrb[39].mxu1  ;;  %v2791_v9 = vadd.f32 %v2786_v5, %v4287_v25 }
 0xaf8   : > { %v2794_v10 = vsel %vm1112_vm2, %v2791_v9, 0.0 }
 0xaf9   : > { %2795 = vadd.xlane.f32.xlu1 %v2794_v10 }
 0xb86   : > { %v2796_v12 = vpop.xlane.xlu1 %2795 }
 0xb87   : > { %v2797_v13 = vmul.f32 0.03125, %v2796_v12 }
 0xb89   : > { %v2798_v14 = vsub.f32 %v2791_v9, %v2797_v13 }
 0xb8b   : > { %v2799_v15 = vmul.f32 %v2798_v14, %v2798_v14 }
 0xb8d   : > { %v2800_v16 = vsel %vm1112_vm2, %v2799_v15, 0.0 }
 0xb8e   : > { %2801 = vadd.xlane.f32.xlu1 %v2800_v16 }
 0xc1b   : > { %v2802_v23 = vpop.xlane.xlu1 %2801 }
 0xc1c   : > { %v2803_v25 = vmul.f32 0.03125, %v2802_v23 }
 0xc1e   : > { %v2804_v26 = vadd.f32 1e-05, %v2803_v25 }
 0xc20   : > { %3559 = vrsqrt.f32 %v2804_v26 }
 0xc2a   : > { %v3560_v27 = vpop.eup %3559 }
 0xc2b   : > { %v2806_v29 = vmul.f32 %v3560_v27, %v2798_v14 }
 0xc2d   : > { %v2813_v30 = vmul.f32 %v3136_v28, %v2806_v29 }
 0xc2f   : > { %v2820_v31 = vadd.f32 %v3137_v45, %v2813_v30 }
 0xc31   : > { %v2821_v32 = vpack.c.bf16 %v2820_v31, %v2820_v31 }
 0xc33   : > { %3394 = vmatmul.mubr.msk.bf16.vlgmr.msra.gmra.mrb[56].mxu0 %vm1112_vm2, %v2821_v32 }
 0xd06   : > { %v2879_v35 = vpop.f32.mrb[56].mxu0 }
 0xd07   : > { %v2880_v50 = vadd.f32 %v2879_v35, %v2829_v34  ;;  %v3395_v40 = vpop.f32.mrb[57].mxu0 }
 0xd08   : > { %v2882_v41 = vpop.f32.mrb[58].mxu0 }
 0xd09   : > { %v2892_v42 = vadd.f32 %v3141_v38, %v2880_v50  ;;  %v3396_v43 = vpop.f32.mrb[59].mxu0 }
 0xd0b   : > { %2893 = vst [vmem:[%s716_s3] sm:$0xff] %v2892_v42 }
 0xd0c   : > { %3575 = shalt.err (!%p3572_p3)
}
 0xd0d   : > { %s3576_s0 = scalar_lea.hbm %s4375_s28, 128  ;;  %s3580_s7 = scalar_lea.hbm %s4483_s27, 256 }
 0xd0e   : > { %p3577_p4 = scmp.ne.s32.totalorder %s4375_s28, %s3576_s0  ;;  %p3581_p9 = scmp.lt.u32.totalorder %s4375_s28, %s4483_s27 }
 0xd0f   : > { %p3582_p10 = scmp.lt.u32.totalorder %s3580_s7, %s3576_s0  ;;  %p3584_p12 = scmp.lt.u32.totalorder %s3576_s0, %s4375_s28 }
 0xd10   : > { %p3578_p7 = pnand %p3577_p4, %p3794_p5 }
 0xd11   : > { %p3583_p11 = por %p3582_p10, %p3581_p9 }
 0xd12   : > { %p3579_p8 = pneg %p3578_p7 }
 0xd13   : > { %p3585_p13 = por %p3584_p12, %p3583_p11 }
 0xd15   : > { %p3586_p0 = pnand %p3585_p13, %p3579_p8 }
 0xd17   : > { %3589 = shalt.err (!%p3586_p0)
}
 0xd18   : > { %3398 = dma.vmem_to_hbm [thread:$0]  (%p3794_p5), %s4377_s23, 128, %s4375_s28, %s2895_s2  }
 0xd19 PF: > { %s4484_s1 = sld [smem:[#allocation7_spill]]  ;;  %s4485_s5 = sld [smem:[#allocation5_spill]] }
 0xd1f   : > { %p3404_p1 = scmp.ge.s32.totalorder %s4484_s1, 2  ;;  %s2920_s6 = sand.u32 1, %s4485_s5  }
 0xd20   : > { %s2921_s3 = scalar_lea.sflag [#allocation3], %s2920_s6 }
 0xd21   : > { %p3401_p2 = pnand %p3404_p1, %p3798_p6 }
 0xd23   : > { %3607 = dma.done.wait (!%p3401_p2), %s2921_s3, 128  }
 0xd24   : > { %3609 = vsyncadd (!%p3401_p2), %s2921_s3, 4294967168  ;;  %s4487_s25 = sld [smem:[#allocation8_spill]]  ;;  %s4488_s0 = sld [smem:[#allocation6_spill]] }
 0xd25   : > { %s4489_s24 = sld [smem:[#allocation9_spill]]  ;;  %s4490_s4 = smov %s3616_s30 }
 0xd2a   : > { %p33_p3 = scmp.ge.s32.totalorder %s4487_s25, 4   ;;  %s4491_s30 = smov %s4488_s0 }
 0xd2c   :  { %35 = sbr.rel (!%p33_p3) target bundleno = 13 (0xd), region = 150 }
 0xd33   :  { %2926 = vsyncpa [#allocation3], 1 }
 0xd34   :  { %2928 = vsyncpa [#allocation3 + $0x1], 1 }

</bundles_post_ra>
